<compile_context>
chip_gen: v7x
topology: tpu7x:2x2x1
jax: 0.10.0
libtpu: 0.0.40
codegen_flags: <defaults>
</compile_context>

<pallas_src>
import jax
import jax.numpy as jnp
import numpy as np
from jax.experimental import pallas as pl
from jax.experimental.pallas import tpu as pltpu

# Small shapes consistent with the module. channels=32 so SELayer's
# channel // reduction (=16) gives a non-degenerate hidden size of 2.
B, C, H, W = 2, 32, 8, 8
REDUCTION = 16
CR = C // REDUCTION           # 2
BN_EPS = 1e-5
WC = W * C                    # 256  lane-dense working width (2 x 128 lanes)
KB = 3 * WC                   # 768  fused-K (3 kh taps) per conv matmul
assert W & (W - 1) == 0, "log2(W) lane-roll fold in the SE tail assumes W is a power of 2"


def _num_batch_shards() -> int:
    """Grid length. v7x has 2 TensorCores -> one image per parallel grid step;
    single-TC v5e/v6e do best with grid=(1,) and the whole batch stacked into
    the matmul M dimension (avoids per-step grid overhead, fills MXU rows)."""
    try:
        kind = jax.devices()[0].device_kind.lower()
    except Exception:
        return 1
    if B % 2 == 0 and ("v7" in kind or "7x" in kind):
        return 2
    return 1


NB = _num_batch_shards()      # grid length
NIMG = B // NB                # images per grid step
M = NIMG * H                  # matmul M dimension per grid step


def basic_block_kernel(x_ref, w1_ref, s1_ref, b1_ref, w2_ref, s2_ref, b2_ref,
                       fc1t_ref, fc2t_ref, out_ref):
    # Stack this step's images along the matmul M dimension (tile-aligned (H, WC)
    # pieces concatenated along sublanes).
    xm = jnp.concatenate([x_ref[b] for b in range(NIMG)], axis=0)        # (M, WC) f32

    # Row-within-image index, hoisted once and reused by both convs: masks the
    # kh=0 / kh=2 taps at image top/bottom rows (replaces zero-padding).
    rid = jax.lax.broadcasted_iota(jnp.int32, (M, WC), 0) % H
    not_top = rid != 0
    not_bot = rid != (H - 1)

    def conv3x3(act, w_ref):
        # kh taps = aligned sublane rolls of the same (M, WC) tile (XLU) + a VPU
        # select at image borders; kw taps are pre-folded into a block-banded
        # weight built against UNPADDED columns, so the whole 3x3 conv is ONE
        # MXU matmul with K = 3*WC = 768 (bf16 operands, f32 accumulation).
        z = jnp.zeros_like(act)
        up = jnp.where(not_top, pltpu.roll(act, 1, axis=0), z)           # in[h-1]
        dn = jnp.where(not_bot, pltpu.roll(act, M - 1, axis=0), z)       # in[h+1]
        k = jnp.concatenate([up, act, dn], axis=1).astype(jnp.bfloat16)  # (M, KB)
        return jnp.dot(k, w_ref[...], preferred_element_type=jnp.float32)  # (M, WC) f32

    # conv1 + folded bn1 + relu; conv2 + folded bn2 (lane-dense full-vreg ops).
    out1 = jnp.maximum(conv3x3(xm, w1_ref) * s1_ref[...] + b1_ref[...], 0.0)
    out2 = conv3x3(out1, w2_ref) * s2_ref[...] + b2_ref[...]             # (M, WC) f32

    # SE (per-image gate) + channel scale + residual + final relu, all lane-dense.
    for b in range(NIMG):
        o2 = out2[b * H:(b + 1) * H, :]                                  # (H, WC) aligned slice
        t = jnp.sum(o2, axis=0, keepdims=True)                           # (1, WC) sublane reduce
        # Fold the W column blocks with log2(W) full-vreg lane rolls; every block
        # then holds sum_{h,w}.  The 1/(H*W) pool average and the W-fold
        # replication factor are pre-folded into fc1t.
        s = (W // 2) * C
        while s >= C:
            t = t + pltpu.roll(t, s, axis=1)
            s //= 2
        # fc1 (C -> C/r): broadcast-mult + lane reduce, then relu.  (VPU/XLU only.)
        hidden = jnp.maximum(
            jnp.sum(t * fc1t_ref[...], axis=1, keepdims=True), 0.0)      # (CR, 1)
        # fc2 (C/r -> C): broadcast-mult + sublane reduce, then sigmoid (EUP).
        gate = jax.nn.sigmoid(
            jnp.sum(hidden * fc2t_ref[...], axis=0, keepdims=True))      # (1, WC) lane-dense
        out_ref[b] = jnp.maximum(o2 * gate + xm[b * H:(b + 1) * H, :], 0.0)


def _band_weights(w_hwio):
    """Fold the kw taps of a (3,3,Cin,Cout) HWIO conv weight into a kh-stacked
    block-banded matrix (3*W*Cin, W*Cout) built against UNPADDED columns
    (out-of-range kw taps are simply absent), so each conv is a single
    [in[h-1], in[h], in[h+1]] x band matmul with no lane padding.
    One-time, host-side (numpy)."""
    w = np.asarray(w_hwio, np.float32)
    KH, KW, Cin, Cout = w.shape
    m = np.zeros((KH, W * Cin, W * Cout), np.float32)
    for wo in range(W):
        for kw in range(KW):
            wi = wo + kw - 1
            if 0 <= wi < W:
                m[:, wi * Cin:(wi + 1) * Cin, wo * Cout:(wo + 1) * Cout] = w[:, kw]
    return jnp.asarray(m.reshape(KH * W * Cin, W * Cout), jnp.bfloat16)


def prepare_params(params):
    """One-time (load-time) folding into the kernel's lane-dense layout: banded
    bf16 conv weights, eval-mode BN folded to per-channel scale/bias tiled to
    width W*C, and SE fc weights pre-tiled to width W*C (pool average 1/(H*W)
    and the W-fold replication 1/W folded into fc1^T).  Kept out of the
    per-call jit on purpose."""
    (w1, g1, be1, m1, v1, w2, g2, be2, m2, v2, fc1, fc2) = [
        np.asarray(p, np.float32) for p in params]
    inv1 = 1.0 / np.sqrt(v1 + BN_EPS)
    inv2 = 1.0 / np.sqrt(v2 + BN_EPS)
    s1 = jnp.asarray(np.tile(g1 * inv1, W).reshape(1, WC))
    b1 = jnp.asarray(np.tile(be1 - m1 * g1 * inv1, W).reshape(1, WC))
    s2 = jnp.asarray(np.tile(g2 * inv2, W).reshape(1, WC))
    b2 = jnp.asarray(np.tile(be2 - m2 * g2 * inv2, W).reshape(1, WC))
    bw1 = _band_weights(w1)                                              # (768, 256) bf16
    bw2 = _band_weights(w2)
    fc1t = jnp.asarray(np.tile(fc1.T, (1, W)) * (1.0 / (H * W * W)))     # (CR, WC)
    fc2t = jnp.asarray(np.tile(fc2, (1, W)))                             # (CR, WC)
    return (bw1, s1, b1, bw2, s2, b2, fc1t, fc2t)


@jax.jit
def basic_block_forward(x_nchw, folded):
    """x_nchw: (B, C, H, W) float32 -> (B, C, H, W) float32."""
    bw1, s1, b1, bw2, s2, b2, fc1t, fc2t = folded
    # The folded band bakes W / stride=1 / no-downsample; fail loudly on a mismatch.
    assert x_nchw.shape == (B, C, H, W)
    assert bw1.shape == (KB, WC) and bw2.shape == (KB, WC) and fc1t.shape == (CR, WC)

    # TODO(synk): in a full network keep activations in this lane-dense (B, H, W*C)
    # layout between blocks so the NCHW<->NHWC transposes happen once per model.
    x = jnp.transpose(x_nchw, (0, 2, 3, 1)).reshape(B, H, WC)            # (B, H, W*C)

    out = pl.pallas_call(
        basic_block_kernel,
        out_shape=jax.ShapeDtypeStruct((B, H, WC), jnp.float32),
        grid_spec=pltpu.PrefetchScalarGridSpec(
            num_scalar_prefetch=0,
            grid=(NB,),
            in_specs=[
                pl.BlockSpec((NIMG, H, WC), lambda b: (b, 0, 0)),        # x (per-step images)
                # Constant-index operands below (weights / folded BN / fc).
                pl.BlockSpec((KB, WC), lambda b: (0, 0)),                # banded conv1 weight
                pl.BlockSpec((1, WC), lambda b: (0, 0)),                 # bn1 scale
                pl.BlockSpec((1, WC), lambda b: (0, 0)),                 # bn1 bias
                pl.BlockSpec((KB, WC), lambda b: (0, 0)),                # banded conv2 weight
                pl.BlockSpec((1, WC), lambda b: (0, 0)),                 # bn2 scale
                pl.BlockSpec((1, WC), lambda b: (0, 0)),                 # bn2 bias
                pl.BlockSpec((CR, WC), lambda b: (0, 0)),                # fc1^T (tiled, scaled)
                pl.BlockSpec((CR, WC), lambda b: (0, 0)),                # fc2 (tiled)
            ],
            out_specs=pl.BlockSpec((NIMG, H, WC), lambda b: (b, 0, 0)),
        ),
        compiler_params=pltpu.CompilerParams(
            dimension_semantics=("parallel",)),                          # v7x: 2 TCs over batch
    )(x, bw1, s1, b1, bw2, s2, b2, fc1t, fc2t)

    return jnp.transpose(out.reshape(B, H, W, C), (0, 3, 1, 2))          # back to NCHW


@jax.jit
def reference_forward(x_nchw, params):
    """Pure-JAX reference (same math, f32 convs) for a sanity check."""
    (w1, g1, be1, m1, v1, w2, g2, be2, m2, v2, fc1, fc2) = params
    x = jnp.transpose(x_nchw, (0, 2, 3, 1)).astype(jnp.float32)

    def conv(inp, w):
        return jax.lax.conv_general_dilated(
            inp, w, window_strides=(1, 1), padding=((1, 1), (1, 1)),
            dimension_numbers=("NHWC", "HWIO", "NHWC"))

    def bn(inp, g, b, m, v):
        return (inp - m) / jnp.sqrt(v + BN_EPS) * g + b

    out = jax.nn.relu(bn(conv(x, w1), g1, be1, m1, v1))
    out = bn(conv(out, w2), g2, be2, m2, v2)
    y = jnp.mean(out, axis=(1, 2))                    # (B, C)
    y = jax.nn.sigmoid(jax.nn.relu(y @ fc1) @ fc2)
    out = jax.nn.relu(out * y[:, None, None, :] + x)
    return jnp.transpose(out, (0, 3, 1, 2))


def init_params():
    keys = jax.random.split(jax.random.PRNGKey(42), 10)
    w1 = jax.random.normal(keys[0], (3, 3, C, C), jnp.float32) * 0.1   # HWIO
    w2 = jax.random.normal(keys[1], (3, 3, C, C), jnp.float32) * 0.1
    g1 = 1.0 + 0.1 * jax.random.normal(keys[2], (C,), jnp.float32)
    be1 = 0.1 * jax.random.normal(keys[3], (C,), jnp.float32)
    m1 = 0.1 * jax.random.normal(keys[4], (C,), jnp.float32)
    v1 = jnp.abs(1.0 + 0.1 * jax.random.normal(keys[5], (C,), jnp.float32))
    g2 = 1.0 + 0.1 * jax.random.normal(keys[6], (C,), jnp.float32)
    be2 = 0.1 * jax.random.normal(keys[7], (C,), jnp.float32)
    m2 = 0.1 * jax.random.normal(keys[8], (C,), jnp.float32)
    v2 = jnp.abs(1.0 + 0.1 * jax.random.normal(keys[9], (C,), jnp.float32))
    kf = jax.random.split(jax.random.PRNGKey(7), 2)
    fc1 = jax.random.normal(kf[0], (C, CR), jnp.float32) * 0.3          # Linear(C, C//r)
    fc2 = jax.random.normal(kf[1], (CR, C), jnp.float32) * 0.3          # Linear(C//r, C)
    return (w1, g1, be1, m1, v1, w2, g2, be2, m2, v2, fc1, fc2)


if __name__ == "__main__":
    params = init_params()
    folded = prepare_params(params)        # one-time, host-side parameter folding
    x = jax.random.normal(jax.random.PRNGKey(0), (B, C, H, W), jnp.float32)

    out = jax.block_until_ready(basic_block_forward(x, folded))
    ref = jax.block_until_ready(reference_forward(x, params))

    assert out.shape == (B, C, H, W)
    # Tolerance sized for bf16 MXU operands (f32 accumulation / f32 elementwise).
    assert jnp.allclose(out, ref, atol=5e-2, rtol=1e-2), \
        f"max abs diff {float(jnp.max(jnp.abs(out - ref)))}"

    print("KERNEL_OK")
</pallas_src>

<mosaic_0001>
module attributes {stable_mosaic.version = 11 : i64} {
  func.func @basic_block_kernel(%arg0: i32, %arg1: memref<2x8x256xf32, #tpu.memory_space<vmem>>, %arg2: memref<768x256xbf16, #tpu.memory_space<vmem>>, %arg3: memref<1x256xf32, #tpu.memory_space<vmem>>, %arg4: memref<1x256xf32, #tpu.memory_space<vmem>>, %arg5: memref<768x256xbf16, #tpu.memory_space<vmem>>, %arg6: memref<1x256xf32, #tpu.memory_space<vmem>>, %arg7: memref<1x256xf32, #tpu.memory_space<vmem>>, %arg8: memref<2x256xf32, #tpu.memory_space<vmem>>, %arg9: memref<2x256xf32, #tpu.memory_space<vmem>>, %arg10: memref<2x8x256xf32, #tpu.memory_space<vmem>>) attributes {dimension_semantics = [#tpu.dimension_semantics<parallel>], iteration_bounds = array<i64: 1>, scalar_prefetch = 0 : i64, scratch_operands = 0 : i64, tpu.core_type = #tpu.core_type<tc>, window_params = [{transform_indices = @transform_0, window_bounds = array<i64: 2, 8, 256>}, {pipeline_mode = #tpu.pipeline_mode<synchronous>, transform_indices = @transform_1, window_bounds = array<i64: 768, 256>}, {pipeline_mode = #tpu.pipeline_mode<synchronous>, transform_indices = @transform_2, window_bounds = array<i64: 1, 256>}, {pipeline_mode = #tpu.pipeline_mode<synchronous>, transform_indices = @transform_3, window_bounds = array<i64: 1, 256>}, {pipeline_mode = #tpu.pipeline_mode<synchronous>, transform_indices = @transform_4, window_bounds = array<i64: 768, 256>}, {pipeline_mode = #tpu.pipeline_mode<synchronous>, transform_indices = @transform_5, window_bounds = array<i64: 1, 256>}, {pipeline_mode = #tpu.pipeline_mode<synchronous>, transform_indices = @transform_6, window_bounds = array<i64: 1, 256>}, {pipeline_mode = #tpu.pipeline_mode<synchronous>, transform_indices = @transform_7, window_bounds = array<i64: 2, 256>}, {pipeline_mode = #tpu.pipeline_mode<synchronous>, transform_indices = @transform_8, window_bounds = array<i64: 2, 256>}, {transform_indices = @transform_9, window_bounds = array<i64: 2, 8, 256>}]} {
    %c0 = arith.constant 0 : index
    %c0_0 = arith.constant 0 : index
    %c0_1 = arith.constant 0 : index
    %0 = vector.load %arg1[%c0, %c0_0, %c0_1] : memref<2x8x256xf32, #tpu.memory_space<vmem>>, vector<1x8x256xf32>
    %1 = vector.shape_cast %0 : vector<1x8x256xf32> to vector<8x256xf32>
    %c1 = arith.constant 1 : index
    %c0_2 = arith.constant 0 : index
    %c0_3 = arith.constant 0 : index
    %2 = vector.load %arg1[%c1, %c0_2, %c0_3] : memref<2x8x256xf32, #tpu.memory_space<vmem>>, vector<1x8x256xf32>
    %3 = vector.shape_cast %2 : vector<1x8x256xf32> to vector<8x256xf32>
    %4 = tpu.concatenate %1, %3 in 0 : vector<8x256xf32>, vector<8x256xf32> -> vector<16x256xf32>
    %5 = tpu.iota {dimensions = array<i32: 0>} : vector<16x256xi32>
    %c8_i32 = arith.constant 8 : i32
    %c0_i32 = arith.constant 0 : i32
    %6 = arith.cmpi eq, %c8_i32, %c0_i32 : i32
    %c1_i32 = arith.constant 1 : i32
    %7 = arith.select %6, %c1_i32, %c8_i32 : i32
    %8 = vector.broadcast %7 : i32 to vector<16x256xi32>
    %9 = arith.remsi %5, %8 : vector<16x256xi32>
    %c0_i32_4 = arith.constant 0 : i32
    %10 = vector.broadcast %c0_i32_4 : i32 to vector<16x256xi32>
    %11 = arith.cmpi ne, %9, %10 : vector<16x256xi32>
    %c0_i32_5 = arith.constant 0 : i32
    %12 = vector.broadcast %c0_i32_5 : i32 to vector<16x256xi32>
    %13 = arith.cmpi slt, %9, %12 : vector<16x256xi32>
    %c0_i32_6 = arith.constant 0 : i32
    %14 = arith.cmpi slt, %7, %c0_i32_6 : i32
    %15 = vector.broadcast %14 : i1 to vector<16x256xi1>
    %16 = vector.broadcast %15 : vector<16x256xi1> to vector<16x256xi1>
    %17 = arith.xori %13, %16 : vector<16x256xi1>
    %18 = arith.andi %17, %11 : vector<16x256xi1>
    %19 = vector.broadcast %7 : i32 to vector<16x256xi32>
    %20 = arith.addi %9, %19 : vector<16x256xi32>
    %21 = arith.select %18, %20, %9 : vector<16x256xi1>, vector<16x256xi32>
    %c0_i32_7 = arith.constant 0 : i32
    %22 = vector.broadcast %c0_i32_7 : i32 to vector<16x256xi32>
    %23 = arith.cmpi ne, %21, %22 : vector<16x256xi32>
    %c7_i32 = arith.constant 7 : i32
    %24 = vector.broadcast %c7_i32 : i32 to vector<16x256xi32>
    %25 = arith.cmpi ne, %21, %24 : vector<16x256xi32>
    %cst = arith.constant 0.000000e+00 : f32
    %26 = vector.broadcast %cst : f32 to vector<16x256xf32>
    %c1_i32_8 = arith.constant 1 : i32
    %27 = tpu.dynamic_rotate %4 by %c1_i32_8 dim 0 : vector<16x256xf32>, i32 -> vector<16x256xf32>
    %28 = arith.select %23, %27, %26 : vector<16x256xi1>, vector<16x256xf32>
    %c15_i32 = arith.constant 15 : i32
    %29 = tpu.dynamic_rotate %4 by %c15_i32 dim 0 : vector<16x256xf32>, i32 -> vector<16x256xf32>
    %30 = arith.select %25, %29, %26 : vector<16x256xi1>, vector<16x256xf32>
    %31 = tpu.concatenate %28, %4, %30 in 1 : vector<16x256xf32>, vector<16x256xf32>, vector<16x256xf32> -> vector<16x768xf32>
    %32 = arith.truncf %31 : vector<16x768xf32> to vector<16x768xbf16>
    %c0_9 = arith.constant 0 : index
    %c0_10 = arith.constant 0 : index
    %33 = vector.load %arg2[%c0_9, %c0_10] : memref<768x256xbf16, #tpu.memory_space<vmem>>, vector<768x256xbf16>
    %cst_11 = arith.constant dense<0.000000e+00> : vector<16x256xf32>
    %34 = tpu.matmul %32, %33, %cst_11 {dimension_numbers = #tpu.dot_dimension_numbers<[1], [0], [0], [1], [0, 0, 1, 1], [], []>} : vector<16x768xbf16>, vector<768x256xbf16>, vector<16x256xf32> -> vector<16x256xf32>
    %c0_12 = arith.constant 0 : index
    %c0_13 = arith.constant 0 : index
    %35 = vector.load %arg3[%c0_12, %c0_13] : memref<1x256xf32, #tpu.memory_space<vmem>>, vector<1x256xf32>
    %36 = vector.broadcast %35 : vector<1x256xf32> to vector<16x256xf32>
    %37 = arith.mulf %34, %36 : vector<16x256xf32>
    %c0_14 = arith.constant 0 : index
    %c0_15 = arith.constant 0 : index
    %38 = vector.load %arg4[%c0_14, %c0_15] : memref<1x256xf32, #tpu.memory_space<vmem>>, vector<1x256xf32>
    %39 = vector.broadcast %38 : vector<1x256xf32> to vector<16x256xf32>
    %40 = arith.addf %37, %39 : vector<16x256xf32>
    %cst_16 = arith.constant 0.000000e+00 : f32
    %41 = vector.broadcast %cst_16 : f32 to vector<16x256xf32>
    %42 = arith.maximumf %40, %41 : vector<16x256xf32>
    %cst_17 = arith.constant 0.000000e+00 : f32
    %43 = vector.broadcast %cst_17 : f32 to vector<16x256xf32>
    %c1_i32_18 = arith.constant 1 : i32
    %44 = tpu.dynamic_rotate %42 by %c1_i32_18 dim 0 : vector<16x256xf32>, i32 -> vector<16x256xf32>
    %45 = arith.select %23, %44, %43 : vector<16x256xi1>, vector<16x256xf32>
    %c15_i32_19 = arith.constant 15 : i32
    %46 = tpu.dynamic_rotate %42 by %c15_i32_19 dim 0 : vector<16x256xf32>, i32 -> vector<16x256xf32>
    %47 = arith.select %25, %46, %43 : vector<16x256xi1>, vector<16x256xf32>
    %48 = tpu.concatenate %45, %42, %47 in 1 : vector<16x256xf32>, vector<16x256xf32>, vector<16x256xf32> -> vector<16x768xf32>
    %49 = arith.truncf %48 : vector<16x768xf32> to vector<16x768xbf16>
    %c0_20 = arith.constant 0 : index
    %c0_21 = arith.constant 0 : index
    %50 = vector.load %arg5[%c0_20, %c0_21] : memref<768x256xbf16, #tpu.memory_space<vmem>>, vector<768x256xbf16>
    %cst_22 = arith.constant dense<0.000000e+00> : vector<16x256xf32>
    %51 = tpu.matmul %49, %50, %cst_22 {dimension_numbers = #tpu.dot_dimension_numbers<[1], [0], [0], [1], [0, 0, 1, 1], [], []>} : vector<16x768xbf16>, vector<768x256xbf16>, vector<16x256xf32> -> vector<16x256xf32>
    %c0_23 = arith.constant 0 : index
    %c0_24 = arith.constant 0 : index
    %52 = vector.load %arg6[%c0_23, %c0_24] : memref<1x256xf32, #tpu.memory_space<vmem>>, vector<1x256xf32>
    %53 = vector.broadcast %52 : vector<1x256xf32> to vector<16x256xf32>
    %54 = arith.mulf %51, %53 : vector<16x256xf32>
    %c0_25 = arith.constant 0 : index
    %c0_26 = arith.constant 0 : index
    %55 = vector.load %arg7[%c0_25, %c0_26] : memref<1x256xf32, #tpu.memory_space<vmem>>, vector<1x256xf32>
    %56 = vector.broadcast %55 : vector<1x256xf32> to vector<16x256xf32>
    %57 = arith.addf %54, %56 : vector<16x256xf32>
    %58 = vector.extract_strided_slice %57 {offsets = [0, 0], sizes = [8, 256], strides = [1, 1]} : vector<16x256xf32> to vector<8x256xf32>
    %cst_27 = arith.constant dense<0.000000e+00> : vector<256xf32>
    %59 = vector.multi_reduction <add>, %58, %cst_27 [0] : vector<8x256xf32> to vector<256xf32>
    %60 = vector.shape_cast %59 : vector<256xf32> to vector<1x256xf32>
    %c128_i32 = arith.constant 128 : i32
    %61 = tpu.dynamic_rotate %60 by %c128_i32 dim 1 : vector<1x256xf32>, i32 -> vector<1x256xf32>
    %62 = arith.addf %60, %61 : vector<1x256xf32>
    %c64_i32 = arith.constant 64 : i32
    %63 = tpu.dynamic_rotate %62 by %c64_i32 dim 1 : vector<1x256xf32>, i32 -> vector<1x256xf32>
    %64 = arith.addf %62, %63 : vector<1x256xf32>
    %c32_i32 = arith.constant 32 : i32
    %65 = tpu.dynamic_rotate %64 by %c32_i32 dim 1 : vector<1x256xf32>, i32 -> vector<1x256xf32>
    %66 = arith.addf %64, %65 : vector<1x256xf32>
    %c0_28 = arith.constant 0 : index
    %c0_29 = arith.constant 0 : index
    %67 = vector.load %arg8[%c0_28, %c0_29] : memref<2x256xf32, #tpu.memory_space<vmem>>, vector<2x256xf32>
    %68 = vector.broadcast %66 : vector<1x256xf32> to vector<2x256xf32>
    %69 = arith.mulf %68, %67 : vector<2x256xf32>
    %cst_30 = arith.constant dense<0.000000e+00> : vector<2xf32>
    %70 = vector.multi_reduction <add>, %69, %cst_30 [1] : vector<2x256xf32> to vector<2xf32>
    %71 = vector.shape_cast %70 : vector<2xf32> to vector<2x1xf32>
    %cst_31 = arith.constant 0.000000e+00 : f32
    %72 = vector.broadcast %cst_31 : f32 to vector<2x1xf32>
    %73 = arith.maximumf %71, %72 : vector<2x1xf32>
    %c0_32 = arith.constant 0 : index
    %c0_33 = arith.constant 0 : index
    %74 = vector.load %arg9[%c0_32, %c0_33] : memref<2x256xf32, #tpu.memory_space<vmem>>, vector<2x256xf32>
    %75 = vector.broadcast %73 : vector<2x1xf32> to vector<2x256xf32>
    %76 = arith.mulf %75, %74 : vector<2x256xf32>
    %cst_34 = arith.constant dense<0.000000e+00> : vector<256xf32>
    %77 = vector.multi_reduction <add>, %76, %cst_34 [0] : vector<2x256xf32> to vector<256xf32>
    %78 = vector.shape_cast %77 : vector<256xf32> to vector<1x256xf32>
    %79 = arith.negf %78 : vector<1x256xf32>
    %80 = math.exp %79 : vector<1x256xf32>
    %cst_35 = arith.constant 1.000000e+00 : f32
    %81 = vector.broadcast %cst_35 : f32 to vector<1x256xf32>
    %82 = arith.addf %81, %80 : vector<1x256xf32>
    %83 = arith.divf %81, %82 : vector<1x256xf32>
    %84 = vector.broadcast %83 : vector<1x256xf32> to vector<8x256xf32>
    %85 = arith.mulf %58, %84 : vector<8x256xf32>
    %86 = vector.extract_strided_slice %4 {offsets = [0, 0], sizes = [8, 256], strides = [1, 1]} : vector<16x256xf32> to vector<8x256xf32>
    %87 = arith.addf %85, %86 : vector<8x256xf32>
    %cst_36 = arith.constant 0.000000e+00 : f32
    %88 = vector.broadcast %cst_36 : f32 to vector<8x256xf32>
    %89 = arith.maximumf %87, %88 : vector<8x256xf32>
    %c0_37 = arith.constant 0 : index
    %c0_38 = arith.constant 0 : index
    %c0_39 = arith.constant 0 : index
    %90 = vector.load %arg10[%c0_37, %c0_38, %c0_39] : memref<2x8x256xf32, #tpu.memory_space<vmem>>, vector<1x8x256xf32>
    %91 = vector.shape_cast %90 : vector<1x8x256xf32> to vector<8x256xf32>
    %92 = vector.shape_cast %89 : vector<8x256xf32> to vector<1x8x256xf32>
    tpu.vector_store %arg10[%c0_37, %c0_38, %c0_39], %92 {strides = array<i32>} : memref<2x8x256xf32, #tpu.memory_space<vmem>>, vector<1x8x256xf32>,
    %93 = vector.extract_strided_slice %57 {offsets = [8, 0], sizes = [8, 256], strides = [1, 1]} : vector<16x256xf32> to vector<8x256xf32>
    %cst_40 = arith.constant dense<0.000000e+00> : vector<256xf32>
    %94 = vector.multi_reduction <add>, %93, %cst_40 [0] : vector<8x256xf32> to vector<256xf32>
    %95 = vector.shape_cast %94 : vector<256xf32> to vector<1x256xf32>
    %c128_i32_41 = arith.constant 128 : i32
    %96 = tpu.dynamic_rotate %95 by %c128_i32_41 dim 1 : vector<1x256xf32>, i32 -> vector<1x256xf32>
    %97 = arith.addf %95, %96 : vector<1x256xf32>
    %c64_i32_42 = arith.constant 64 : i32
    %98 = tpu.dynamic_rotate %97 by %c64_i32_42 dim 1 : vector<1x256xf32>, i32 -> vector<1x256xf32>
    %99 = arith.addf %97, %98 : vector<1x256xf32>
    %c32_i32_43 = arith.constant 32 : i32
    %100 = tpu.dynamic_rotate %99 by %c32_i32_43 dim 1 : vector<1x256xf32>, i32 -> vector<1x256xf32>
    %101 = arith.addf %99, %100 : vector<1x256xf32>
    %c0_44 = arith.constant 0 : index
    %c0_45 = arith.constant 0 : index
    %102 = vector.load %arg8[%c0_44, %c0_45] : memref<2x256xf32, #tpu.memory_space<vmem>>, vector<2x256xf32>
    %103 = vector.broadcast %101 : vector<1x256xf32> to vector<2x256xf32>
    %104 = arith.mulf %103, %102 : vector<2x256xf32>
    %cst_46 = arith.constant dense<0.000000e+00> : vector<2xf32>
    %105 = vector.multi_reduction <add>, %104, %cst_46 [1] : vector<2x256xf32> to vector<2xf32>
    %106 = vector.shape_cast %105 : vector<2xf32> to vector<2x1xf32>
    %cst_47 = arith.constant 0.000000e+00 : f32
    %107 = vector.broadcast %cst_47 : f32 to vector<2x1xf32>
    %108 = arith.maximumf %106, %107 : vector<2x1xf32>
    %c0_48 = arith.constant 0 : index
    %c0_49 = arith.constant 0 : index
    %109 = vector.load %arg9[%c0_48, %c0_49] : memref<2x256xf32, #tpu.memory_space<vmem>>, vector<2x256xf32>
    %110 = vector.broadcast %108 : vector<2x1xf32> to vector<2x256xf32>
    %111 = arith.mulf %110, %109 : vector<2x256xf32>
    %cst_50 = arith.constant dense<0.000000e+00> : vector<256xf32>
    %112 = vector.multi_reduction <add>, %111, %cst_50 [0] : vector<2x256xf32> to vector<256xf32>
    %113 = vector.shape_cast %112 : vector<256xf32> to vector<1x256xf32>
    %114 = arith.negf %113 : vector<1x256xf32>
    %115 = math.exp %114 : vector<1x256xf32>
    %cst_51 = arith.constant 1.000000e+00 : f32
    %116 = vector.broadcast %cst_51 : f32 to vector<1x256xf32>
    %117 = arith.addf %116, %115 : vector<1x256xf32>
    %118 = arith.divf %116, %117 : vector<1x256xf32>
    %119 = vector.broadcast %118 : vector<1x256xf32> to vector<8x256xf32>
    %120 = arith.mulf %93, %119 : vector<8x256xf32>
    %121 = vector.extract_strided_slice %4 {offsets = [8, 0], sizes = [8, 256], strides = [1, 1]} : vector<16x256xf32> to vector<8x256xf32>
    %122 = arith.addf %120, %121 : vector<8x256xf32>
    %cst_52 = arith.constant 0.000000e+00 : f32
    %123 = vector.broadcast %cst_52 : f32 to vector<8x256xf32>
    %124 = arith.maximumf %122, %123 : vector<8x256xf32>
    %c1_53 = arith.constant 1 : index
    %c0_54 = arith.constant 0 : index
    %c0_55 = arith.constant 0 : index
    %125 = vector.load %arg10[%c1_53, %c0_54, %c0_55] : memref<2x8x256xf32, #tpu.memory_space<vmem>>, vector<1x8x256xf32>
    %126 = vector.shape_cast %125 : vector<1x8x256xf32> to vector<8x256xf32>
    %127 = vector.shape_cast %124 : vector<8x256xf32> to vector<1x8x256xf32>
    tpu.vector_store %arg10[%c1_53, %c0_54, %c0_55], %127 {strides = array<i32>} : memref<2x8x256xf32, #tpu.memory_space<vmem>>, vector<1x8x256xf32>,
    return
  }
  func.func @transform_0(%arg0: i32) -> (i32, i32, i32) {
    %c0_i32 = arith.constant 0 : i32
    %c0_i32_0 = arith.constant 0 : i32
    %c0_i32_1 = arith.constant 0 : i32
    return %arg0, %c0_i32, %c0_i32_0 : i32, i32, i32
  }
  func.func @transform_1(%arg0: i32) -> (i32, i32) {
    %c0_i32 = arith.constant 0 : i32
    %c0_i32_0 = arith.constant 0 : i32
    %c0_i32_1 = arith.constant 0 : i32
    return %c0_i32, %c0_i32_0 : i32, i32
  }
  func.func @transform_2(%arg0: i32) -> (i32, i32) {
    %c0_i32 = arith.constant 0 : i32
    %c0_i32_0 = arith.constant 0 : i32
    %c0_i32_1 = arith.constant 0 : i32
    return %c0_i32, %c0_i32_0 : i32, i32
  }
  func.func @transform_3(%arg0: i32) -> (i32, i32) {
    %c0_i32 = arith.constant 0 : i32
    %c0_i32_0 = arith.constant 0 : i32
    %c0_i32_1 = arith.constant 0 : i32
    return %c0_i32, %c0_i32_0 : i32, i32
  }
  func.func @transform_4(%arg0: i32) -> (i32, i32) {
    %c0_i32 = arith.constant 0 : i32
    %c0_i32_0 = arith.constant 0 : i32
    %c0_i32_1 = arith.constant 0 : i32
    return %c0_i32, %c0_i32_0 : i32, i32
  }
  func.func @transform_5(%arg0: i32) -> (i32, i32) {
    %c0_i32 = arith.constant 0 : i32
    %c0_i32_0 = arith.constant 0 : i32
    %c0_i32_1 = arith.constant 0 : i32
    return %c0_i32, %c0_i32_0 : i32, i32
  }
  func.func @transform_6(%arg0: i32) -> (i32, i32) {
    %c0_i32 = arith.constant 0 : i32
    %c0_i32_0 = arith.constant 0 : i32
    %c0_i32_1 = arith.constant 0 : i32
    return %c0_i32, %c0_i32_0 : i32, i32
  }
  func.func @transform_7(%arg0: i32) -> (i32, i32) {
    %c0_i32 = arith.constant 0 : i32
    %c0_i32_0 = arith.constant 0 : i32
    %c0_i32_1 = arith.constant 0 : i32
    return %c0_i32, %c0_i32_0 : i32, i32
  }
  func.func @transform_8(%arg0: i32) -> (i32, i32) {
    %c0_i32 = arith.constant 0 : i32
    %c0_i32_0 = arith.constant 0 : i32
    %c0_i32_1 = arith.constant 0 : i32
    return %c0_i32, %c0_i32_0 : i32, i32
  }
  func.func @transform_9(%arg0: i32) -> (i32, i32, i32) {
    %c0_i32 = arith.constant 0 : i32
    %c0_i32_0 = arith.constant 0 : i32
    %c0_i32_1 = arith.constant 0 : i32
    return %arg0, %c0_i32, %c0_i32_0 : i32, i32, i32
  }
}

</mosaic_0001>

<bundles_post_ra>
// kernel: basic_block_forward.1
= control target key start
LH: loop header
LB: loop body
LE: loop exit
PB: predicated region body
PF: predicated region fallthrough
CT: control target
= control target key end

     0   :  { %14 = vsyncpa [#allocation3], 0  ;;  %s2736_s0 = inlined_call_operand.vmem [shape: f32[2,8,256], index: 0, kind: input, shape index: {}]   ;;  %s2737_s1 = inlined_call_operand.hbm [shape: bf16[768,256], index: 1, kind: input, shape index: {}]   ;;  %s2738_s2 = inlined_call_operand.vmem [shape: f32[1,256], index: 2, kind: input, shape index: {}]   ;;  %s2739_s3 = inlined_call_operand.vmem [shape: f32[1,256], index: 3, kind: input, shape index: {}]   ;;  %s2740_s4 = inlined_call_operand.hbm [shape: bf16[768,256], index: 4, kind: input, shape index: {}]   ;;  %s2741_s5 = inlined_call_operand.vmem [shape: f32[1,256], index: 5, kind: input, shape index: {}]   ;;  %s2742_s6 = inlined_call_operand.vmem [shape: f32[1,256], index: 6, kind: input, shape index: {}]   ;;  %s2743_s7 = inlined_call_operand.vmem [shape: f32[2,256], index: 7, kind: input, shape index: {}]   ;;  %s2744_s8 = inlined_call_operand.vmem [shape: f32[2,256], index: 8, kind: input, shape index: {}]   ;;  %s2745_s9 = inlined_call_operand.vmem [shape: f32[2,8,256], index: 9, kind: output, shape index: {}]  }
   0x1   :  { %15 = vsyncpa [#allocation5], 0  ;;  %s2434_s30 = smov [#allocation2]   ;;  %s2386_s13 = scalar_lea.hbm %s2737_s1, 12288 }
   0x2   :  { %s23_s10 = sshll.u32 %s2434_s30, 4  ;;  %p2387_p0 = scmp.ne.s32.totalorder %s2737_s1, %s2386_s13  ;;  %s24_s10 = int_to_ptr.vmem [resolvable:$true] %s23_s10 }
   0x3   :  { %p2390_p1 = scmp.lt.u32.totalorder %s2386_s13, %s2737_s1 }
   0x5   :  { %p2392_p2 = pnand %p2390_p1, %p2387_p0 }
   0x7   :  { %2395 = shalt.err (!%p2392_p2)
}
   0x8   :  { %s2396_s18 = scalar_lea.vmem %s24_s10, 12288  ;;  %p2401_p4 = scmp.lt.s32.totalorder %s24_s10, %s24_s10 }
   0x9   :  { %p2397_p3 = scmp.ne.s32.totalorder %s24_s10, %s2396_s18  ;;  %p2402_p5 = scmp.lt.s32.totalorder %s2396_s18, %s2396_s18 }
   0xb   :  { %p2403_p6 = por %p2402_p5, %p2401_p4 }
   0xd   :  { %p2404_p7 = pnand %p2403_p6, %p2397_p3 }
   0xf   :  { %2407 = shalt.err (!%p2404_p7)
}
  0x10   :  { %s2435_s19 = smov 128   ;;  %s2436_s20 = smov 8  }
  0x11   :  { %29 = dma.hbm_to_vmem [thread:$0]  %s2737_s1, 12288, %s24_s10, [#allocation3], %s2435_s19, %s2435_s19, %s2436_s20  }
  0x12   :  { %s2437_s23 = smov [#allocation4]   ;;  %s2408_s27 = scalar_lea.hbm %s2740_s4, 12288 }
  0x13   :  { %s39_s24 = sshll.u32 %s2437_s23, 4  ;;  %p2409_p8 = scmp.ne.s32.totalorder %s2740_s4, %s2408_s27  ;;  %s40_s24 = int_to_ptr.vmem [resolvable:$true] %s39_s24 }
  0x14   :  { %p2412_p9 = scmp.lt.u32.totalorder %s2408_s27, %s2740_s4 }
  0x16   :  { %p2414_p10 = pnand %p2412_p9, %p2409_p8 }
  0x18   :  { %2417 = shalt.err (!%p2414_p10)
}
  0x19   :  { %s2418_s12 = scalar_lea.vmem %s40_s24, 12288  ;;  %p2423_p12 = scmp.lt.s32.totalorder %s40_s24, %s40_s24 }
  0x1a   :  { %p2419_p11 = scmp.ne.s32.totalorder %s40_s24, %s2418_s12  ;;  %p2424_p13 = scmp.lt.s32.totalorder %s2418_s12, %s2418_s12 }
  0x1c   :  { %p2425_p0 = por %p2424_p13, %p2423_p12 }
  0x1e   :  { %p2426_p1 = pnand %p2425_p0, %p2419_p11 }
  0x20   :  { %2429 = shalt.err (!%p2426_p1)
}
  0x21   :  { %45 = dma.hbm_to_vmem [thread:$0]  %s2740_s4, 12288, %s40_s24, [#allocation5], %s2435_s19, %s2435_s19, %s2436_s20  }
  0x22   :  { %2430 = dma.done.wait [#allocation3], 12288  }
  0x23   :  { %2431 = vsyncadd [#allocation3], 4294955008 }
  0x24   :  { %2432 = dma.done.wait [#allocation5], 12288  }
  0x25   :  { %2433 = vsyncadd [#allocation5], 4294955008  ;;  %v2078_v0 = vld [vmem:[#allocation2 + $0x4] ss:$8 sps:$4 sm:$0xff]   ;;  %v2080_v1 = vld [vmem:[#allocation2] ss:$8 sps:$4 sm:$0xff]   ;;  %v65_v5 = vlaneseq }
  0x26   :  { %704 = vmatprep.subr.bf16.mxu0 %v2078_v0  ;;  %v2081_v2 = vld [vmem:[#allocation2 + $0x14] ss:$8 sps:$4 sm:$0xff]   ;;  %v2083_v3 = vld [vmem:[#allocation2 + $0x10] ss:$8 sps:$4 sm:$0xff]   ;;  %v2084_v4 = vld [vmem:[#allocation2 + $0x24] ss:$8 sps:$4 sm:$0xff]  }
  0x27   :  { %705 = vmatpush1.bf16.msra.mxu0 %v2080_v1  ;;  %v2086_v6 = vld [vmem:[#allocation2 + $0x20] ss:$8 sps:$4 sm:$0xff]   ;;  %v2087_v7 = vld [vmem:[#allocation2 + $0x34] ss:$8 sps:$4 sm:$0xff]   ;;  %v2514_v8 = vshrl.u32 %v65_v5, 7  ;;  %vm1675_vm8 = vcmask 1041408  }
  0x28   :  { %706 = vmatprep.subr.bf16.mxu0 %v2081_v2  ;;  %v2089_v9 = vld [vmem:[#allocation2 + $0x30] ss:$8 sps:$4 sm:$0xff]   ;;  %v2090_v10 = vld [vmem:[#allocation2 + $0x44] ss:$8 sps:$4 sm:$0xff]   ;;  %v2092_v12 = vld [vmem:[#allocation2 + $0x40] ss:$8 sps:$4 sm:$0xff]  }
  0x29   :  { %v2517_v11 = vadd.s32 8, %v2514_v8  ;;  %v2093_v13 = vld [vmem:[#allocation2 + $0x54] ss:$8 sps:$4 sm:$0xff]   ;;  %v72_v14 = vand.u32 7, %v2514_v8  ;;  %v2095_v16 = vld [vmem:[#allocation2 + $0x50] ss:$8 sps:$4 sm:$0xff]  }
  0x2a   :  { %v2096_v17 = vld [vmem:[#allocation2 + $0x64] ss:$8 sps:$4 sm:$0xff]   ;;  %v2529_v19 = vld [vmem:[%s2736_s0 + $0x18] sm:$0xff]  ;;  %vm100_vm2 = vcmp.lt.s32.totalorder %v2514_v8, 1  ;;  %v2098_v22 = vld [vmem:[#allocation2 + $0x60] ss:$8 sps:$4 sm:$0xff]  }
  0x2b   :  { %707 = vmatpush1.bf16.msra.mxu0 %v2083_v3  ;;  %v79_v15 = vand.u32 7, %v2517_v11  ;;  %v2524_v18 = vld [vmem:[%s2736_s0 + $0x8] sm:$0xff]  ;;  %vm92_vm0 = vcmp.ne.s32.totalorder %v72_v14, 0  ;;  %v99_v21 = vrot.slane %v2529_v19, 7  ;;  %v2099_v23 = vld [vmem:[#allocation2 + $0x74] ss:$8 sps:$4 sm:$0xff]  }
  0x2c   :  { %708 = vmatprep.subr.bf16.mxu0 %v2084_v4  ;;  %v97_v20 = vrot.slane %v2524_v18, 7  ;;  %v2101_v28 = vld [vmem:[#allocation2 + $0x70] ss:$8 sps:$4 sm:$0xff]   ;;  %v2102_v29 = vld [vmem:[#allocation2 + $0x84] ss:$8 sps:$4 sm:$0xff]   ;;  %v125_v54 = vpack.c.bf16 %v2529_v19, %v2524_v18  ;;  %vm94_vm4 = vcmp.ne.s32.totalorder %v72_v14, 7 }
  0x2d   :  { %vm93_vm1 = vcmp.ne.s32.totalorder %v79_v15, 0  ;;  %v2104_v30 = vld [vmem:[#allocation2 + $0x80] ss:$8 sps:$4 sm:$0xff]   ;;  %v2105_v31 = vld [vmem:[#allocation2 + $0x94] ss:$8 sps:$4 sm:$0xff]   ;;  %vm95_vm5 = vcmp.ne.s32.totalorder %v79_v15, 7 }
  0x2e   :  { %v102_v24 = vsel %vm100_vm2, %v97_v20, %v99_v21  ;;  %v104_v25 = vsel %vm100_vm2, %v99_v21, %v97_v20  ;;  %vm2542_vm3 = vmpackc.low %vm93_vm1, %vm92_vm0  ;;  %v2107_v32 = vld [vmem:[#allocation2 + $0x90] ss:$8 sps:$4 sm:$0xff]   ;;  %v2108_v33 = vld [vmem:[#allocation2 + $0xa4] ss:$8 sps:$4 sm:$0xff]   ;;  %vm113_vm7 = vcmp.lt.s32.totalorder %v2514_v8, 7 }
  0x2f   :  { %709 = vmatpush1.bf16.msra.mxu0 %v2086_v6  ;;  %v1927_v27 = vpack.c.bf16 %v102_v24, %v104_v25  ;;  %v2110_v34 = vld [vmem:[#allocation2 + $0xa0] ss:$8 sps:$4 sm:$0xff]   ;;  %v2111_v35 = vld [vmem:[#allocation2 + $0xb4] ss:$8 sps:$4 sm:$0xff]   ;;  %v2113_v36 = vld [vmem:[#allocation2 + $0xb0] ss:$8 sps:$4 sm:$0xff]  }
  0x30   :  { %710 = vmatprep.subr.bf16.mxu0 %v2087_v7  ;;  %v2114_v37 = vld [vmem:[#allocation2 + $0xc4] ss:$8 sps:$4 sm:$0xff]   ;;  %v2116_v38 = vld [vmem:[#allocation2 + $0xc0] ss:$8 sps:$4 sm:$0xff]   ;;  %v2117_v39 = vld [vmem:[#allocation2 + $0xd4] ss:$8 sps:$4 sm:$0xff]  }
  0x31   :  { %1928 = vmatprep.mubr.msk.bf16.mxu0 %vm2542_vm3, %v1927_v27  ;;  %v2119_v40 = vld [vmem:[#allocation2 + $0xd0] ss:$8 sps:$4 sm:$0xff]   ;;  %v2120_v41 = vld [vmem:[#allocation2 + $0xe4] ss:$8 sps:$4 sm:$0xff]   ;;  %v2122_v44 = vld [vmem:[#allocation2 + $0xe0] ss:$8 sps:$4 sm:$0xff]  }
  0x32   :  { %v2551_v42 = vld [vmem:[%s2736_s0] sm:$0xff]  ;;  %v2556_v43 = vld [vmem:[%s2736_s0 + $0x10] sm:$0xff]  ;;  %vm2570_vm6 = vmpackc.low %vm95_vm5, %vm94_vm4 }
  0x33   :  { %711 = vmatpush1.bf16.msra.mxu0 %v2089_v9  ;;  %v96_v45 = vrot.slane %v2551_v42, 7  ;;  %v98_v46 = vrot.slane %v2556_v43, 7  ;;  %v2123_v47 = vld [vmem:[#allocation2 + $0xf4] ss:$8 sps:$4 sm:$0xff]   ;;  %v2125_v48 = vld [vmem:[#allocation2 + $0xf0] ss:$8 sps:$4 sm:$0xff]  }
  0x34   :  { %712 = vmatprep.subr.bf16.mxu0 %v2090_v10  ;;  %v2128_v51 = vld [vmem:[#allocation2 + $0x104] ss:$8 sps:$4 sm:$0xff]   ;;  %v2126_v53 = vld [vmem:[#allocation2 + $0x100] ss:$8 sps:$4 sm:$0xff]   ;;  %v2131_v55 = vld [vmem:[#allocation2 + $0x114] ss:$8 sps:$4 sm:$0xff]  }
  0x35   :  { %v101_v49 = vsel %vm100_vm2, %v96_v45, %v98_v46  ;;  %v103_v50 = vsel %vm100_vm2, %v98_v46, %v96_v45  ;;  %v2129_v56 = vld [vmem:[#allocation2 + $0x110] ss:$8 sps:$4 sm:$0xff]   ;;  %v2222_v58 = vld [vmem:[#allocation4 + $0x4] ss:$8 sps:$4 sm:$0xff]   ;;  %v2224_v59 = vld [vmem:[#allocation4] ss:$8 sps:$4 sm:$0xff]  }
  0x36   :  { %v1930_v52 = vpack.c.bf16 %v101_v49, %v103_v50  ;;  %v2134_v60 = vld [vmem:[#allocation2 + $0x124] ss:$8 sps:$4 sm:$0xff]   ;;  %1475 = vmatprep.subr.bf16.mxu1 %v2222_v58  ;;  %v2225_v61 = vld [vmem:[#allocation4 + $0x14] ss:$8 sps:$4 sm:$0xff]   ;;  %v2227_v62 = vld [vmem:[#allocation4 + $0x10] ss:$8 sps:$4 sm:$0xff]  }
  0x37   :  { %713 = vmatpush1.bf16.msra.mxu0 %v2092_v12  ;;  %1476 = vmatpush1.bf16.msra.mxu1 %v2224_v59  ;;  %v2228_v63 = vld [vmem:[#allocation4 + $0x24] ss:$8 sps:$4 sm:$0xff]   ;;  %v2132_v0 = vld [vmem:[#allocation2 + $0x120] ss:$8 sps:$4 sm:$0xff]   ;;  %v2137_v1 = vld [vmem:[#allocation2 + $0x134] ss:$8 sps:$4 sm:$0xff]   ;;  %v124_v59 = vpack.c.bf16 %v2556_v43, %v2551_v42 }
  0x38   :  { %714 = vmatprep.subr.bf16.mxu0 %v2093_v13  ;;  %1477 = vmatprep.subr.bf16.mxu1 %v2225_v61  ;;  %v2230_v2 = vld [vmem:[#allocation4 + $0x20] ss:$8 sps:$4 sm:$0xff]   ;;  %v2231_v3 = vld [vmem:[#allocation4 + $0x34] ss:$8 sps:$4 sm:$0xff]   ;;  %v2135_v4 = vld [vmem:[#allocation2 + $0x130] ss:$8 sps:$4 sm:$0xff]  }
  0x39   :  { %v2140_v5 = vld [vmem:[#allocation2 + $0x144] ss:$8 sps:$4 sm:$0xff]   ;;  %v2233_v6 = vld [vmem:[#allocation4 + $0x30] ss:$8 sps:$4 sm:$0xff]   ;;  %v2138_v9 = vld [vmem:[#allocation2 + $0x140] ss:$8 sps:$4 sm:$0xff]  }
  0x3a   :  { %v2234_v7 = vld [vmem:[#allocation4 + $0x44] ss:$8 sps:$4 sm:$0xff]   ;;  %v2143_v10 = vld [vmem:[#allocation2 + $0x154] ss:$8 sps:$4 sm:$0xff]   ;;  %v2141_v11 = vld [vmem:[#allocation2 + $0x150] ss:$8 sps:$4 sm:$0xff]  }
  0x3b   :  { %715 = vmatpush1.bf16.msra.mxu0 %v2095_v16  ;;  %1478 = vmatpush1.bf16.msra.mxu1 %v2227_v62  ;;  %v2236_v12 = vld [vmem:[#allocation4 + $0x40] ss:$8 sps:$4 sm:$0xff]   ;;  %v2146_v13 = vld [vmem:[#allocation2 + $0x164] ss:$8 sps:$4 sm:$0xff]   ;;  %v2237_v14 = vld [vmem:[#allocation4 + $0x54] ss:$8 sps:$4 sm:$0xff]  }
  0x3c   :  { %716 = vmatprep.subr.bf16.mxu0 %v2096_v17  ;;  %1479 = vmatprep.subr.bf16.mxu1 %v2228_v63  ;;  %v2239_v15 = vld [vmem:[#allocation4 + $0x50] ss:$8 sps:$4 sm:$0xff]   ;;  %v2240_v16 = vld [vmem:[#allocation4 + $0x64] ss:$8 sps:$4 sm:$0xff]   ;;  %v2144_v17 = vld [vmem:[#allocation2 + $0x160] ss:$8 sps:$4 sm:$0xff]  }
  0x3d   :  { %v2149_v20 = vld [vmem:[#allocation2 + $0x174] ss:$8 sps:$4 sm:$0xff]   ;;  %v2242_v21 = vld [vmem:[#allocation4 + $0x60] ss:$8 sps:$4 sm:$0xff]   ;;  %v2152_v24 = vld [vmem:[#allocation2 + $0x184] ss:$8 sps:$4 sm:$0xff]  }
  0x3e   :  { %v2245_v25 = vld [vmem:[#allocation4 + $0x70] ss:$8 sps:$4 sm:$0xff]   ;;  %v2246_v27 = vld [vmem:[#allocation4 + $0x84] ss:$8 sps:$4 sm:$0xff]   ;;  %v2162_v46 = vld [vmem:[#allocation2 + $0x1c0] ss:$8 sps:$4 sm:$0xff]  }
  0x3f   :  { %717 = vmatpush1.bf16.msra.mxu0 %v2098_v22  ;;  %1480 = vmatpush1.bf16.msra.mxu1 %v2230_v2  ;;  %v2243_v22 = vld [vmem:[#allocation4 + $0x74] ss:$8 sps:$4 sm:$0xff]   ;;  %v2258_v45 = vld [vmem:[#allocation4 + $0xc4] ss:$8 sps:$4 sm:$0xff]   ;;  %v2168_v50 = vld [vmem:[#allocation2 + $0x1e0] ss:$8 sps:$4 sm:$0xff]  }
  0x40   :  { %718 = vmatprep.subr.bf16.mxu0 %v2099_v23  ;;  %1481 = vmatprep.subr.bf16.mxu1 %v2231_v3  ;;  %v2147_v23 = vld [vmem:[#allocation2 + $0x170] ss:$8 sps:$4 sm:$0xff]   ;;  %v2170_v49 = vld [vmem:[#allocation2 + $0x1e4] ss:$8 sps:$4 sm:$0xff]   ;;  %v2180_v63 = vld [vmem:[#allocation2 + $0x220] ss:$8 sps:$4 sm:$0xff]  }
  0x41   :  { %v2177_v61 = vld [vmem:[#allocation2 + $0x210] ss:$8 sps:$4 sm:$0xff]   ;;  %v2182_v62 = vld [vmem:[#allocation2 + $0x224] ss:$8 sps:$4 sm:$0xff]   ;;  %v2186_v3 = vld [vmem:[#allocation2 + $0x240] ss:$8 sps:$4 sm:$0xff]  }
  0x42   :  { %v2188_v2 = vld [vmem:[#allocation2 + $0x244] ss:$8 sps:$4 sm:$0xff]   ;;  %v2285_v26 = vld [vmem:[#allocation4 + $0x150] ss:$8 sps:$4 sm:$0xff]  }
  0x43   :  { %719 = vmatpush1.bf16.msra.mxu0 %v2101_v28  ;;  %1482 = vmatpush1.bf16.msra.mxu1 %v2233_v6  ;;  %v2150_v28 = vld [vmem:[#allocation2 + $0x180] ss:$8 sps:$4 sm:$0xff]   ;;  %v2194_v6 = vld [vmem:[#allocation2 + $0x264] ss:$8 sps:$4 sm:$0xff]  }
  0x44   :  { %720 = vmatprep.subr.bf16.mxu0 %v2102_v29  ;;  %1483 = vmatprep.subr.bf16.mxu1 %v2234_v7  ;;  %v2155_v29 = vld [vmem:[#allocation2 + $0x194] ss:$8 sps:$4 sm:$0xff]   ;;  %v2192_v7 = vld [vmem:[#allocation2 + $0x260] ss:$8 sps:$4 sm:$0xff]  }
  0x47   :  { %721 = vmatpush1.bf16.msra.mxu0 %v2104_v30  ;;  %1484 = vmatpush1.bf16.msra.mxu1 %v2236_v12  ;;  %v2248_v30 = vld [vmem:[#allocation4 + $0x80] ss:$8 sps:$4 sm:$0xff]  }
  0x48   :  { %722 = vmatprep.subr.bf16.mxu0 %v2105_v31  ;;  %1485 = vmatprep.subr.bf16.mxu1 %v2237_v14  ;;  %v2249_v31 = vld [vmem:[#allocation4 + $0x94] ss:$8 sps:$4 sm:$0xff]   ;;  %v2198_v12 = vld [vmem:[#allocation2 + $0x280] ss:$8 sps:$4 sm:$0xff]   ;;  %v2201_v14 = vld [vmem:[#allocation2 + $0x290] ss:$8 sps:$4 sm:$0xff]  }
  0x4b   :  { %723 = vmatpush1.bf16.msra.mxu0 %v2107_v32  ;;  %1486 = vmatpush1.bf16.msra.mxu1 %v2239_v15  ;;  %v2153_v32 = vld [vmem:[#allocation2 + $0x190] ss:$8 sps:$4 sm:$0xff]   ;;  %v2206_v15 = vld [vmem:[#allocation2 + $0x2a4] ss:$8 sps:$4 sm:$0xff]  }
  0x4c   :  { %724 = vmatprep.subr.bf16.mxu0 %v2108_v33  ;;  %1487 = vmatprep.subr.bf16.mxu1 %v2240_v16  ;;  %v2158_v33 = vld [vmem:[#allocation2 + $0x1a4] ss:$8 sps:$4 sm:$0xff]   ;;  %v2204_v16 = vld [vmem:[#allocation2 + $0x2a0] ss:$8 sps:$4 sm:$0xff]  }
  0x4f   :  { %725 = vmatpush1.bf16.msra.mxu0 %v2110_v34  ;;  %1488 = vmatpush1.bf16.msra.mxu1 %v2242_v21  ;;  %v2251_v34 = vld [vmem:[#allocation4 + $0x90] ss:$8 sps:$4 sm:$0xff]   ;;  %v2212_v21 = vld [vmem:[#allocation2 + $0x2c4] ss:$8 sps:$4 sm:$0xff]  }
  0x50   :  { %726 = vmatprep.subr.bf16.mxu0 %v2111_v35  ;;  %1489 = vmatprep.subr.bf16.mxu1 %v2243_v22  ;;  %v2252_v35 = vld [vmem:[#allocation4 + $0xa4] ss:$8 sps:$4 sm:$0xff]   ;;  %v2210_v22 = vld [vmem:[#allocation2 + $0x2c0] ss:$8 sps:$4 sm:$0xff]  }
  0x53   :  { %727 = vmatpush1.bf16.msra.mxu0 %v2113_v36  ;;  %1490 = vmatpush1.bf16.msra.mxu1 %v2245_v25  ;;  %v2156_v36 = vld [vmem:[#allocation2 + $0x1a0] ss:$8 sps:$4 sm:$0xff]   ;;  %v2218_v25 = vld [vmem:[#allocation2 + $0x2e4] ss:$8 sps:$4 sm:$0xff]  }
  0x54   :  { %728 = vmatprep.subr.bf16.mxu0 %v2114_v37  ;;  %1491 = vmatprep.subr.bf16.mxu1 %v2246_v27  ;;  %v2161_v37 = vld [vmem:[#allocation2 + $0x1b4] ss:$8 sps:$4 sm:$0xff]   ;;  %v2216_v27 = vld [vmem:[#allocation2 + $0x2e0] ss:$8 sps:$4 sm:$0xff]  }
  0x57   :  { %729 = vmatpush1.bf16.msra.mxu0 %v2116_v38  ;;  %1492 = vmatpush1.bf16.msra.mxu1 %v2248_v30  ;;  %v2254_v38 = vld [vmem:[#allocation4 + $0xa0] ss:$8 sps:$4 sm:$0xff]   ;;  %v2221_v30 = vld [vmem:[#allocation2 + $0x2f4] ss:$8 sps:$4 sm:$0xff]  }
  0x58   :  { %730 = vmatprep.subr.bf16.mxu0 %v2117_v39  ;;  %1493 = vmatprep.subr.bf16.mxu1 %v2249_v31  ;;  %v2255_v39 = vld [vmem:[#allocation4 + $0xb4] ss:$8 sps:$4 sm:$0xff]   ;;  %v2219_v31 = vld [vmem:[#allocation2 + $0x2f0] ss:$8 sps:$4 sm:$0xff]  }
  0x5b   :  { %731 = vmatpush1.bf16.msra.mxu0 %v2119_v40  ;;  %1494 = vmatpush1.bf16.msra.mxu1 %v2251_v34  ;;  %v2159_v40 = vld [vmem:[#allocation2 + $0x1b0] ss:$8 sps:$4 sm:$0xff]  }
  0x5c   :  { %732 = vmatprep.subr.bf16.mxu0 %v2120_v41  ;;  %1495 = vmatprep.subr.bf16.mxu1 %v2252_v35  ;;  %v2164_v41 = vld [vmem:[#allocation2 + $0x1c4] ss:$8 sps:$4 sm:$0xff]   ;;  %v2260_v35 = vld [vmem:[#allocation4 + $0xc0] ss:$8 sps:$4 sm:$0xff]  }
  0x5f   :  { %733 = vmatpush1.bf16.msra.mxu0 %v2122_v44  ;;  %1496 = vmatpush1.bf16.msra.mxu1 %v2254_v38  ;;  %v2257_v44 = vld [vmem:[#allocation4 + $0xb0] ss:$8 sps:$4 sm:$0xff]   ;;  %v2267_v38 = vld [vmem:[#allocation4 + $0xf4] ss:$8 sps:$4 sm:$0xff]  }
  0x60   :  { %734 = vmatprep.subr.bf16.mxu0 %v2123_v47  ;;  %1497 = vmatprep.subr.bf16.mxu1 %v2255_v39  ;;  %v2167_v47 = vld [vmem:[#allocation2 + $0x1d4] ss:$8 sps:$4 sm:$0xff]   ;;  %v2269_v39 = vld [vmem:[#allocation4 + $0xf0] ss:$8 sps:$4 sm:$0xff]  }
  0x63   :  { %735 = vmatpush1.bf16.msra.mxu0 %v2125_v48  ;;  %1498 = vmatpush1.bf16.msra.mxu1 %v2257_v44  ;;  %v2165_v48 = vld [vmem:[#allocation2 + $0x1d0] ss:$8 sps:$4 sm:$0xff]   ;;  %v833_v44 = vld [vmem:[%s2738_s2] sm:$0x3] }
  0x64   :  { %747 = vmatprep.subr.bf16.mxu0 %v2128_v51  ;;  %1499 = vmatprep.subr.bf16.mxu1 %v2258_v45  ;;  %v2173_v51 = vld [vmem:[#allocation2 + $0x1f4] ss:$8 sps:$4 sm:$0xff]   ;;  %v2602_v45 = vsub.s32 1, %v2514_v8 }
  0x66   :  { %1931 = vmatmul.mubr.msk.bf16.vlgmr.msra.gmra.mrb[0].mxu0 %vm2542_vm3, %v1930_v52  ;;  %v110_v52 = vrot.slane %v2524_v18, 1 }
  0x67   :  { %748 = vmatpush1.bf16.msra.mxu0 %v2126_v53  ;;  %779 = vmatprep.mubr.bf16.mxu0 %v125_v54  ;;  %v112_v53 = vrot.slane %v2529_v19, 1  ;;  %v2171_v54 = vld [vmem:[#allocation2 + $0x1f0] ss:$8 sps:$4 sm:$0xff]   ;;  %v2179_v19 = vld [vmem:[#allocation2 + $0x214] ss:$8 sps:$4 sm:$0xff]  }
  0x68   :  { %749 = vmatprep.subr.bf16.mxu0 %v2131_v55  ;;  %v2176_v55 = vld [vmem:[#allocation2 + $0x204] ss:$8 sps:$4 sm:$0xff]   ;;  %1500 = vmatpush1.bf16.msra.mxu1 %v2260_v35  ;;  %v2282_v35 = vld [vmem:[#allocation4 + $0x140] ss:$8 sps:$4 sm:$0xff]  }
  0x69   :  { %v117_v58 = vsel %vm113_vm7, %v112_v53, %v110_v52 }
  0x6b   :  { %750 = vmatpush1.bf16.msra.mxu0 %v2129_v56  ;;  %v115_v56 = vsel %vm113_vm7, %v110_v52, %v112_v53 }
  0x6c   :  { %751 = vmatprep.subr.bf16.mxu0 %v2134_v60  ;;  %v2174_v60 = vld [vmem:[#allocation2 + $0x200] ss:$8 sps:$4 sm:$0xff]   ;;  %v1933_v18 = vpack.c.bf16 %v117_v58, %v115_v56 }
  0x6f   :  { %752 = vmatpush1.bf16.msra.mxu0 %v2132_v0  ;;  %v2185_v0 = vld [vmem:[#allocation2 + $0x234] ss:$8 sps:$4 sm:$0xff]  }
  0x70   :  { %753 = vmatprep.subr.bf16.mxu0 %v2137_v1  ;;  %v2183_v1 = vld [vmem:[#allocation2 + $0x230] ss:$8 sps:$4 sm:$0xff]  }
  0x73   :  { %754 = vmatpush1.bf16.msra.mxu0 %v2135_v4  ;;  %v2191_v4 = vld [vmem:[#allocation2 + $0x254] ss:$8 sps:$4 sm:$0xff]  }
  0x74   :  { %755 = vmatprep.subr.bf16.mxu0 %v2140_v5  ;;  %v2189_v5 = vld [vmem:[#allocation2 + $0x250] ss:$8 sps:$4 sm:$0xff]  }
  0x77   :  { %756 = vmatpush1.bf16.msra.mxu0 %v2138_v9  ;;  %v2197_v9 = vld [vmem:[#allocation2 + $0x274] ss:$8 sps:$4 sm:$0xff]  }
  0x78   :  { %757 = vmatprep.subr.bf16.mxu0 %v2143_v10  ;;  %v2195_v10 = vld [vmem:[#allocation2 + $0x270] ss:$8 sps:$4 sm:$0xff]  }
  0x7b   :  { %758 = vmatpush1.bf16.msra.mxu0 %v2141_v11  ;;  %v2200_v11 = vld [vmem:[#allocation2 + $0x284] ss:$8 sps:$4 sm:$0xff]  }
  0x7c   :  { %759 = vmatprep.subr.bf16.mxu0 %v2146_v13  ;;  %v2203_v13 = vld [vmem:[#allocation2 + $0x294] ss:$8 sps:$4 sm:$0xff]  }
  0x7f   :  { %760 = vmatpush1.bf16.msra.mxu0 %v2144_v17  ;;  %v2209_v17 = vld [vmem:[#allocation2 + $0x2b4] ss:$8 sps:$4 sm:$0xff]  }
  0x80   :  { %761 = vmatprep.subr.bf16.mxu0 %v2149_v20  ;;  %v2207_v20 = vld [vmem:[#allocation2 + $0x2b0] ss:$8 sps:$4 sm:$0xff]  }
  0x83   :  { %762 = vmatpush1.bf16.msra.mxu0 %v2147_v23  ;;  %v2215_v23 = vld [vmem:[#allocation2 + $0x2d4] ss:$8 sps:$4 sm:$0xff]  }
  0x84   :  { %763 = vmatprep.subr.bf16.mxu0 %v2152_v24  ;;  %v2213_v24 = vld [vmem:[#allocation2 + $0x2d0] ss:$8 sps:$4 sm:$0xff]  }
  0x87   :  { %764 = vmatpush1.bf16.msra.mxu0 %v2150_v28  ;;  %v109_v28 = vrot.slane %v2551_v42, 1  ;;  %v2261_v42 = vld [vmem:[#allocation4 + $0xd4] ss:$8 sps:$4 sm:$0xff]  }
  0x88   :  { %765 = vmatprep.subr.bf16.mxu0 %v2155_v29  ;;  %v111_v29 = vrot.slane %v2556_v43, 1  ;;  %v2263_v43 = vld [vmem:[#allocation4 + $0xd0] ss:$8 sps:$4 sm:$0xff]   ;;  %1501 = vmatprep.subr.bf16.mxu1 %v2261_v42  ;;  %v2287_v42 = vld [vmem:[#allocation4 + $0x154] ss:$8 sps:$4 sm:$0xff]  }
  0x89   :  { %1502 = vmatpush1.bf16.msra.mxu1 %v2263_v43  ;;  %v2290_v43 = vld [vmem:[#allocation4 + $0x164] ss:$8 sps:$4 sm:$0xff]  }
  0x8b   :  { %766 = vmatpush1.bf16.msra.mxu0 %v2153_v32  ;;  %v114_v32 = vsel %vm113_vm7, %v109_v28, %v111_v29 }
  0x8c   :  { %767 = vmatprep.subr.bf16.mxu0 %v2158_v33  ;;  %v116_v33 = vsel %vm113_vm7, %v111_v29, %v109_v28  ;;  %v2275_v28 = vld [vmem:[#allocation4 + $0x114] ss:$8 sps:$4 sm:$0xff]  }
  0x8d   :  { %v1936_v34 = vpack.c.bf16 %v116_v33, %v114_v32  ;;  %v2281_v32 = vld [vmem:[#allocation4 + $0x134] ss:$8 sps:$4 sm:$0xff]   ;;  %v2279_v33 = vld [vmem:[#allocation4 + $0x130] ss:$8 sps:$4 sm:$0xff]  }
  0x8f   :  { %768 = vmatpush1.bf16.msra.mxu0 %v2156_v36  ;;  %v2264_v36 = vld [vmem:[#allocation4 + $0xe4] ss:$8 sps:$4 sm:$0xff]  }
  0x90   :  { %769 = vmatprep.subr.bf16.mxu0 %v2161_v37  ;;  %v2266_v37 = vld [vmem:[#allocation4 + $0xe0] ss:$8 sps:$4 sm:$0xff]   ;;  %1503 = vmatprep.subr.bf16.mxu1 %v2264_v36 }
  0x91   :  { %1504 = vmatpush1.bf16.msra.mxu1 %v2266_v37  ;;  %v2288_v36 = vld [vmem:[#allocation4 + $0x160] ss:$8 sps:$4 sm:$0xff]   ;;  %v2293_v37 = vld [vmem:[#allocation4 + $0x174] ss:$8 sps:$4 sm:$0xff]  }
  0x92   :  { %1505 = vmatprep.subr.bf16.mxu1 %v2267_v38  ;;  %v2291_v38 = vld [vmem:[#allocation4 + $0x170] ss:$8 sps:$4 sm:$0xff]  }
  0x93   :  { %770 = vmatpush1.bf16.msra.mxu0 %v2159_v40  ;;  %v2272_v40 = vld [vmem:[#allocation4 + $0x104] ss:$8 sps:$4 sm:$0xff]  }
  0x94   :  { %771 = vmatprep.subr.bf16.mxu0 %v2164_v41  ;;  %v2596_v41 = vsub.s32 0, %v2514_v8  ;;  %v2278_v8 = vld [vmem:[#allocation4 + $0x124] ss:$8 sps:$4 sm:$0xff]  }
  0x95   :  { %1506 = vmatpush1.bf16.msra.mxu1 %v2269_v39  ;;  %v2296_v39 = vld [vmem:[#allocation4 + $0x184] ss:$8 sps:$4 sm:$0xff]  }
  0x96   :  { %1518 = vmatprep.subr.bf16.mxu1 %v2272_v40  ;;  %v2294_v40 = vld [vmem:[#allocation4 + $0x180] ss:$8 sps:$4 sm:$0xff]  }
  0x97   :  { %772 = vmatpush1.bf16.msra.mxu0 %v2162_v46  ;;  %v849_v46 = vld [vmem:[%s2739_s3] sm:$0x3] }
  0x98   :  { %773 = vmatprep.subr.bf16.mxu0 %v2167_v47  ;;  %v838_v47 = vrot.slane %v833_v44, %v2596_v41 }
  0x9b   :  { %774 = vmatpush1.bf16.msra.mxu0 %v2165_v48  ;;  %v842_v48 = vrot.slane %v833_v44, %v2602_v45  ;;  %v2299_v44 = vld [vmem:[#allocation4 + $0x194] ss:$8 sps:$4 sm:$0xff]  }
  0x9c   :  { %775 = vmatprep.subr.bf16.mxu0 %v2170_v49  ;;  %v854_v49 = vrot.slane %v849_v46, %v2596_v41 }
  0x9f   :  { %776 = vmatpush1.bf16.msra.mxu0 %v2168_v50 }
  0xa0   :  { %777 = vmatprep.subr.bf16.mxu0 %v2173_v51  ;;  %v858_v51 = vrot.slane %v849_v46, %v2602_v45  ;;  %v2297_v46 = vld [vmem:[#allocation4 + $0x190] ss:$8 sps:$4 sm:$0xff]  }
  0xa3   :  { %778 = vmatpush1.bf16.msra.mxu0 %v2171_v54 }
  0xa4   :  { %790 = vmatprep.subr.bf16.mxu0 %v2176_v55 }
  0xa6   :  { %780 = vmatmul.mubr.bf16.vlgmr.msra.gmra.mrb[0].mxu0 %v124_v59 }
  0xa7   :  { %791 = vmatpush1.bf16.msra.mxu0 %v2174_v60  ;;  %1934 = vmatprep.mubr.msk.bf16.mxu0 %vm2570_vm6, %v1933_v18 }
  0xa8   :  { %792 = vmatprep.subr.bf16.mxu0 %v2179_v19 }
  0xab   :  { %793 = vmatpush1.bf16.msra.mxu0 %v2177_v61 }
  0xac   :  { %794 = vmatprep.subr.bf16.mxu0 %v2182_v62 }
  0xaf   :  { %795 = vmatpush1.bf16.msra.mxu0 %v2180_v63 }
  0xb0   :  { %796 = vmatprep.subr.bf16.mxu0 %v2185_v0 }
  0xb3   :  { %797 = vmatpush1.bf16.msra.mxu0 %v2183_v1 }
  0xb4   :  { %798 = vmatprep.subr.bf16.mxu0 %v2188_v2 }
  0xb7   :  { %799 = vmatpush1.bf16.msra.mxu0 %v2186_v3 }
  0xb8   :  { %800 = vmatprep.subr.bf16.mxu0 %v2191_v4 }
  0xbb   :  { %801 = vmatpush1.bf16.msra.mxu0 %v2189_v5 }
  0xbc   :  { %802 = vmatprep.subr.bf16.mxu0 %v2194_v6 }
  0xbf   :  { %803 = vmatpush1.bf16.msra.mxu0 %v2192_v7 }
  0xc0   :  { %804 = vmatprep.subr.bf16.mxu0 %v2197_v9 }
  0xc3   :  { %805 = vmatpush1.bf16.msra.mxu0 %v2195_v10 }
  0xc4   :  { %806 = vmatprep.subr.bf16.mxu0 %v2200_v11 }
  0xc7   :  { %807 = vmatpush1.bf16.msra.mxu0 %v2198_v12 }
  0xc8   :  { %808 = vmatprep.subr.bf16.mxu0 %v2203_v13 }
  0xcb   :  { %809 = vmatpush1.bf16.msra.mxu0 %v2201_v14 }
  0xcc   :  { %810 = vmatprep.subr.bf16.mxu0 %v2206_v15 }
  0xcf   :  { %811 = vmatpush1.bf16.msra.mxu0 %v2204_v16 }
  0xd0   :  { %812 = vmatprep.subr.bf16.mxu0 %v2209_v17 }
  0xd3   :  { %813 = vmatpush1.bf16.msra.mxu0 %v2207_v20 }
  0xd4   :  { %814 = vmatprep.subr.bf16.mxu0 %v2212_v21 }
  0xd7   :  { %815 = vmatpush1.bf16.msra.mxu0 %v2210_v22 }
  0xd8   :  { %816 = vmatprep.subr.bf16.mxu0 %v2215_v23 }
  0xdb   :  { %817 = vmatpush1.bf16.msra.mxu0 %v2213_v24  ;;  %v2270_v24 = vld [vmem:[#allocation4 + $0x100] ss:$8 sps:$4 sm:$0xff]  }
  0xdc   :  { %818 = vmatprep.subr.bf16.mxu0 %v2218_v25 }
  0xdf   :  { %819 = vmatpush1.bf16.msra.mxu0 %v2216_v27 }
  0xe0   :  { %820 = vmatprep.subr.bf16.mxu0 %v2221_v30  ;;  %v2273_v30 = vld [vmem:[#allocation4 + $0x110] ss:$8 sps:$4 sm:$0xff]  }
  0xe3   :  { %821 = vmatpush1.bf16.msra.mxu0 %v2219_v31  ;;  %v2276_v31 = vld [vmem:[#allocation4 + $0x120] ss:$8 sps:$4 sm:$0xff]  }
  0xe6   :  { %1937 = vmatmul.mubr.msk.bf16.vlgmr.msra.gmra.mrb[0].mxu0 %vm2570_vm6, %v1936_v34  ;;  %v2284_v34 = vld [vmem:[#allocation4 + $0x144] ss:$8 sps:$4 sm:$0xff]  }
 0x1b9   :  { %v824_v50 = vpop.f32.mrb[0].mxu0 }
 0x1ba   :  { %v845_v52 = vmul.f32 %v838_v47, %v824_v50  ;;  %v826_v53 = vpop.f32.mrb[1].mxu0  ;;  %v2303_v50 = vld [vmem:[#allocation4 + $0x1b0] ss:$8 sps:$4 sm:$0xff]  }
 0x1bb   :  { %v846_v54 = vmul.f32 %v842_v48, %v826_v53  ;;  %v828_v55 = vpop.f32.mrb[2].mxu0  ;;  %v2311_v53 = vld [vmem:[#allocation4 + $0x1d4] ss:$8 sps:$4 sm:$0xff]  }
 0x1bc   :  { %v861_v56 = vadd.f32 %v854_v49, %v845_v52  ;;  %v847_v58 = vmul.f32 %v838_v47, %v828_v55  ;;  %v830_v59 = vpop.f32.mrb[3].mxu0  ;;  %v2302_v47 = vld [vmem:[#allocation4 + $0x1a4] ss:$8 sps:$4 sm:$0xff]   ;;  %v2306_v52 = vld [vmem:[#allocation4 + $0x1c0] ss:$8 sps:$4 sm:$0xff]  }
 0x1bd   :  { %v862_v60 = vadd.f32 %v858_v51, %v846_v54  ;;  %v848_v18 = vmul.f32 %v842_v48, %v830_v59  ;;  %v2300_v48 = vld [vmem:[#allocation4 + $0x1a0] ss:$8 sps:$4 sm:$0xff]   ;;  %v2309_v54 = vld [vmem:[#allocation4 + $0x1d0] ss:$8 sps:$4 sm:$0xff]   ;;  %v2314_v55 = vld [vmem:[#allocation4 + $0x1e4] ss:$8 sps:$4 sm:$0xff]  }
 0x1be   :  { %v2611_v19 = vmax.f32 %v861_v56, 0.0  ;;  %v863_v61 = vadd.f32 %v854_v49, %v847_v58  ;;  %v2305_v49 = vld [vmem:[#allocation4 + $0x1b4] ss:$8 sps:$4 sm:$0xff]   ;;  %v2312_v56 = vld [vmem:[#allocation4 + $0x1e0] ss:$8 sps:$4 sm:$0xff]  }
 0x1bf   :  { %v866_v62 = vmax.f32 %v862_v60, 0.0  ;;  %v864_v63 = vadd.f32 %v858_v51, %v848_v18  ;;  %v2308_v51 = vld [vmem:[#allocation4 + $0x1c4] ss:$8 sps:$4 sm:$0xff]   ;;  %v2317_v58 = vld [vmem:[#allocation4 + $0x1f4] ss:$8 sps:$4 sm:$0xff]  }
 0x1c0   :  { %v2613_v0 = vmax.f32 %v863_v61, 0.0  ;;  %v869_v1 = vrot.slane %v2611_v19, 7  ;;  %v881_v2 = vrot.slane %v2611_v19, 1  ;;  %v2315_v59 = vld [vmem:[#allocation4 + $0x1f0] ss:$8 sps:$4 sm:$0xff]  }
 0x1c1   :  { %v868_v3 = vmax.f32 %v864_v63, 0.0  ;;  %v882_v4 = vrot.slane %v866_v62, 1  ;;  %v870_v10 = vrot.slane %v866_v62, 7  ;;  %v2320_v60 = vld [vmem:[#allocation4 + $0x204] ss:$8 sps:$4 sm:$0xff]  }
 0x1c2   :  { %v871_v5 = vrot.slane %v2613_v0, 7  ;;  %v883_v6 = vrot.slane %v2613_v0, 1  ;;  %v895_v7 = vpack.c.bf16 %v2613_v0, %v2611_v19  ;;  %v2318_v18 = vld [vmem:[#allocation4 + $0x200] ss:$8 sps:$4 sm:$0xff]   ;;  %v2323_v61 = vld [vmem:[#allocation4 + $0x214] ss:$8 sps:$4 sm:$0xff]  }
 0x1c3   :  { %v884_v9 = vrot.slane %v868_v3, 1  ;;  %v872_v11 = vrot.slane %v868_v3, 7  ;;  %v896_v12 = vpack.c.bf16 %v868_v3, %v866_v62  ;;  %v2321_v62 = vld [vmem:[#allocation4 + $0x210] ss:$8 sps:$4 sm:$0xff]   ;;  %v2326_v63 = vld [vmem:[#allocation4 + $0x224] ss:$8 sps:$4 sm:$0xff]  }
 0x1c4   :  { %v2623_v13 = vsel %vm113_vm7, %v881_v2, %v883_v6  ;;  %v2627_v14 = vsel %vm113_vm7, %v883_v6, %v881_v2  ;;  %v873_v15 = vsel %vm100_vm2, %v869_v1, %v871_v5  ;;  %v875_v16 = vsel %vm100_vm2, %v871_v5, %v869_v1  ;;  %v2324_v1 = vld [vmem:[#allocation4 + $0x220] ss:$8 sps:$4 sm:$0xff]   ;;  %v2329_v2 = vld [vmem:[#allocation4 + $0x234] ss:$8 sps:$4 sm:$0xff]   ;;  %v2327_v3 = vld [vmem:[#allocation4 + $0x230] ss:$8 sps:$4 sm:$0xff]  }
 0x1c5   :  { %v874_v17 = vsel %vm100_vm2, %v870_v10, %v872_v11  ;;  %v876_v20 = vsel %vm100_vm2, %v872_v11, %v870_v10  ;;  %v2038_v21 = vpack.c.bf16 %v873_v15, %v875_v16  ;;  %v2639_v22 = vsel %vm113_vm7, %v882_v4, %v884_v9  ;;  %v2330_v19 = vld [vmem:[#allocation4 + $0x240] ss:$8 sps:$4 sm:$0xff]   ;;  %v2335_v0 = vld [vmem:[#allocation4 + $0x254] ss:$8 sps:$4 sm:$0xff]   ;;  %v2333_v5 = vld [vmem:[#allocation4 + $0x250] ss:$8 sps:$4 sm:$0xff]  }
 0x1c6   :  { %v2035_v23 = vpack.c.bf16 %v874_v17, %v876_v20  ;;  %v2643_v25 = vsel %vm113_vm7, %v884_v9, %v882_v4  ;;  %v2044_v27 = vpack.c.bf16 %v2627_v14, %v2623_v13  ;;  %v2332_v4 = vld [vmem:[#allocation4 + $0x244] ss:$8 sps:$4 sm:$0xff]   ;;  %v2341_v9 = vld [vmem:[#allocation4 + $0x274] ss:$8 sps:$4 sm:$0xff]   ;;  %v2339_v10 = vld [vmem:[#allocation4 + $0x270] ss:$8 sps:$4 sm:$0xff]  }
 0x1c7   :  { %v2041_v29 = vpack.c.bf16 %v2643_v25, %v2639_v22  ;;  %v2338_v6 = vld [vmem:[#allocation4 + $0x264] ss:$8 sps:$4 sm:$0xff]   ;;  %v2347_v15 = vld [vmem:[#allocation4 + $0x294] ss:$8 sps:$4 sm:$0xff]   ;;  %v2345_v16 = vld [vmem:[#allocation4 + $0x290] ss:$8 sps:$4 sm:$0xff]  }
 0x1c8   :  { %2036 = vmatprep.mubr.msk.bf16.mxu1 %vm2542_vm3, %v2035_v23  ;;  %v2344_v11 = vld [vmem:[#allocation4 + $0x284] ss:$8 sps:$4 sm:$0xff]   ;;  %v2348_v20 = vld [vmem:[#allocation4 + $0x2a0] ss:$8 sps:$4 sm:$0xff]   ;;  %v2351_v22 = vld [vmem:[#allocation4 + $0x2b0] ss:$8 sps:$4 sm:$0xff]  }
 0x1c9   :  { %2039 = vmatmul.mubr.msk.bf16.vlgmr.msra.gmra.mrb[0].mxu1 %vm2542_vm3, %v2038_v21  ;;  %v2350_v17 = vld [vmem:[#allocation4 + $0x2a4] ss:$8 sps:$4 sm:$0xff]   ;;  %v2353_v21 = vld [vmem:[#allocation4 + $0x2b4] ss:$8 sps:$4 sm:$0xff]  }
 0x1ca   :  { %1519 = vmatpush1.bf16.msra.mxu1 %v2270_v24  ;;  %1550 = vmatprep.mubr.bf16.mxu1 %v896_v12  ;;  %v2342_v12 = vld [vmem:[#allocation4 + $0x280] ss:$8 sps:$4 sm:$0xff]   ;;  %v2356_v23 = vld [vmem:[#allocation4 + $0x2c4] ss:$8 sps:$4 sm:$0xff]   ;;  %v2359_v25 = vld [vmem:[#allocation4 + $0x2d4] ss:$8 sps:$4 sm:$0xff]  }
 0x1cb   :  { %1520 = vmatprep.subr.bf16.mxu1 %v2275_v28  ;;  %v2354_v24 = vld [vmem:[#allocation4 + $0x2c0] ss:$8 sps:$4 sm:$0xff]   ;;  %v2357_v28 = vld [vmem:[#allocation4 + $0x2d0] ss:$8 sps:$4 sm:$0xff]  }
 0x1ce   :  { %1521 = vmatpush1.bf16.msra.mxu1 %v2273_v30  ;;  %v2360_v30 = vld [vmem:[#allocation4 + $0x2e0] ss:$8 sps:$4 sm:$0xff]  }
 0x1cf   :  { %1522 = vmatprep.subr.bf16.mxu1 %v2278_v8  ;;  %v2365_v8 = vld [vmem:[#allocation4 + $0x2f4] ss:$8 sps:$4 sm:$0xff]  }
 0x1d2   :  { %1523 = vmatpush1.bf16.msra.mxu1 %v2276_v31  ;;  %v2363_v31 = vld [vmem:[#allocation4 + $0x2f0] ss:$8 sps:$4 sm:$0xff]  }
 0x1d3   :  { %1524 = vmatprep.subr.bf16.mxu1 %v2281_v32  ;;  %v1604_v32 = vld [vmem:[%s2741_s5] sm:$0x3]  ;;  %s2438_s5 = smov 64  }
 0x1d6   :  { %1525 = vmatpush1.bf16.msra.mxu1 %v2279_v33  ;;  %v1620_v33 = vld [vmem:[%s2742_s6] sm:$0x3]  ;;  %s2439_s6 = smov 32  }
 0x1d7   :  { %1526 = vmatprep.subr.bf16.mxu1 %v2284_v34  ;;  %v1609_v34 = vrot.slane %v1604_v32, %v2596_v41  ;;  %v1629_v13 = vrot.slane %v1620_v33, %v2602_v45 }
 0x1da   :  { %1527 = vmatpush1.bf16.msra.mxu1 %v2282_v35  ;;  %v1613_v35 = vrot.slane %v1604_v32, %v2602_v45 }
 0x1db   :  { %1528 = vmatprep.subr.bf16.mxu1 %v2287_v42  ;;  %v1625_v42 = vrot.slane %v1620_v33, %v2596_v41 }
 0x1de   :  { %1529 = vmatpush1.bf16.msra.mxu1 %v2285_v26 }
 0x1df   :  { %1530 = vmatprep.subr.bf16.mxu1 %v2290_v43 }
 0x1e2   :  { %1531 = vmatpush1.bf16.msra.mxu1 %v2288_v36 }
 0x1e3   :  { %1532 = vmatprep.subr.bf16.mxu1 %v2293_v37 }
 0x1e6   :  { %1533 = vmatpush1.bf16.msra.mxu1 %v2291_v38 }
 0x1e7   :  { %1534 = vmatprep.subr.bf16.mxu1 %v2296_v39 }
 0x1ea   :  { %1535 = vmatpush1.bf16.msra.mxu1 %v2294_v40 }
 0x1eb   :  { %1536 = vmatprep.subr.bf16.mxu1 %v2299_v44 }
 0x1ee   :  { %1537 = vmatpush1.bf16.msra.mxu1 %v2297_v46 }
 0x1ef   :  { %1538 = vmatprep.subr.bf16.mxu1 %v2302_v47 }
 0x1f2   :  { %1539 = vmatpush1.bf16.msra.mxu1 %v2300_v48 }
 0x1f3   :  { %1540 = vmatprep.subr.bf16.mxu1 %v2305_v49 }
 0x1f6   :  { %1541 = vmatpush1.bf16.msra.mxu1 %v2303_v50 }
 0x1f7   :  { %1542 = vmatprep.subr.bf16.mxu1 %v2308_v51 }
 0x1fa   :  { %1543 = vmatpush1.bf16.msra.mxu1 %v2306_v52 }
 0x1fb   :  { %1544 = vmatprep.subr.bf16.mxu1 %v2311_v53 }
 0x1fe   :  { %1545 = vmatpush1.bf16.msra.mxu1 %v2309_v54 }
 0x1ff   :  { %1546 = vmatprep.subr.bf16.mxu1 %v2314_v55 }
 0x202   :  { %1547 = vmatpush1.bf16.msra.mxu1 %v2312_v56 }
 0x203   :  { %1548 = vmatprep.subr.bf16.mxu1 %v2317_v58 }
 0x206   :  { %1549 = vmatpush1.bf16.msra.mxu1 %v2315_v59 }
 0x207   :  { %1561 = vmatprep.subr.bf16.mxu1 %v2320_v60 }
 0x209   :  { %1551 = vmatmul.mubr.bf16.vlgmr.msra.gmra.mrb[0].mxu1 %v895_v7  ;;  %v2336_v7 = vld [vmem:[#allocation4 + $0x260] ss:$8 sps:$4 sm:$0xff]  }
 0x20a   :  { %1562 = vmatpush1.bf16.msra.mxu1 %v2318_v18  ;;  %2042 = vmatprep.mubr.msk.bf16.mxu1 %vm2570_vm6, %v2041_v29  ;;  %v2362_v29 = vld [vmem:[#allocation4 + $0x2e4] ss:$8 sps:$4 sm:$0xff]  }
 0x20b   :  { %1563 = vmatprep.subr.bf16.mxu1 %v2323_v61 }
 0x20e   :  { %1564 = vmatpush1.bf16.msra.mxu1 %v2321_v62 }
 0x20f   :  { %1565 = vmatprep.subr.bf16.mxu1 %v2326_v63 }
 0x212   :  { %1566 = vmatpush1.bf16.msra.mxu1 %v2324_v1 }
 0x213   :  { %1567 = vmatprep.subr.bf16.mxu1 %v2329_v2 }
 0x216   :  { %1568 = vmatpush1.bf16.msra.mxu1 %v2327_v3 }
 0x217   :  { %1569 = vmatprep.subr.bf16.mxu1 %v2332_v4 }
 0x21a   :  { %1570 = vmatpush1.bf16.msra.mxu1 %v2330_v19 }
 0x21b   :  { %1571 = vmatprep.subr.bf16.mxu1 %v2335_v0 }
 0x21e   :  { %1572 = vmatpush1.bf16.msra.mxu1 %v2333_v5 }
 0x21f   :  { %1573 = vmatprep.subr.bf16.mxu1 %v2338_v6 }
 0x222   :  { %1574 = vmatpush1.bf16.msra.mxu1 %v2336_v7 }
 0x223   :  { %1575 = vmatprep.subr.bf16.mxu1 %v2341_v9 }
 0x226   :  { %1576 = vmatpush1.bf16.msra.mxu1 %v2339_v10 }
 0x227   :  { %1577 = vmatprep.subr.bf16.mxu1 %v2344_v11 }
 0x22a   :  { %1578 = vmatpush1.bf16.msra.mxu1 %v2342_v12  ;;  %v2046_v12 = vld.sshfl [vmem:[%s2743_s7] sm:$0x33 pattern:$0x76325410] }
 0x22b   :  { %1579 = vmatprep.subr.bf16.mxu1 %v2347_v15 }
 0x22e   :  { %1580 = vmatpush1.bf16.msra.mxu1 %v2345_v16 }
 0x22f   :  { %1581 = vmatprep.subr.bf16.mxu1 %v2350_v17  ;;  %v1670_v17 = vcombine.high %v2046_v12, %v2046_v12 }
 0x232   :  { %1582 = vmatpush1.bf16.msra.mxu1 %v2348_v20 }
 0x233   :  { %1583 = vmatprep.subr.bf16.mxu1 %v2353_v21 }
 0x236   :  { %1584 = vmatpush1.bf16.msra.mxu1 %v2351_v22 }
 0x237   :  { %1585 = vmatprep.subr.bf16.mxu1 %v2356_v23 }
 0x23a   :  { %1586 = vmatpush1.bf16.msra.mxu1 %v2354_v24 }
 0x23b   :  { %1587 = vmatprep.subr.bf16.mxu1 %v2359_v25 }
 0x23e   :  { %1588 = vmatpush1.bf16.msra.mxu1 %v2357_v28 }
 0x23f   :  { %1589 = vmatprep.subr.bf16.mxu1 %v2362_v29 }
 0x242   :  { %1590 = vmatpush1.bf16.msra.mxu1 %v2360_v30 }
 0x243   :  { %1591 = vmatprep.subr.bf16.mxu1 %v2365_v8 }
 0x246   :  { %1592 = vmatpush1.bf16.msra.mxu1 %v2363_v31 }
 0x249   :  { %2045 = vmatmul.mubr.msk.bf16.vlgmr.msra.gmra.mrb[0].mxu1 %vm2570_vm6, %v2044_v27 }
 0x31c   :  { %v1595_v26 = vpop.f32.mrb[0].mxu1 }
 0x31d   :  { %v1616_v14 = vmul.f32 %v1609_v34, %v1595_v26  ;;  %v1597_v57 = vpop.f32.mrb[1].mxu1 }
 0x31e   :  { %v1617_v27 = vmul.f32 %v1613_v35, %v1597_v57  ;;  %v1599_v43 = vpop.f32.mrb[2].mxu1 }
 0x31f   :  { %v2676_v36 = vadd.f32 %v1625_v42, %v1616_v14  ;;  %v1618_v37 = vmul.f32 %v1609_v34, %v1599_v43  ;;  %v1601_v38 = vpop.f32.mrb[3].mxu1 }
 0x320   :  { %v2678_v39 = vadd.f32 %v1629_v13, %v1617_v27  ;;  %v1619_v40 = vmul.f32 %v1613_v35, %v1601_v38  ;;  %v2047_v35 = vld.sshfl [vmem:[%s2744_s8] sm:$0x33 pattern:$0x76325410] }
 0x321   :  { %v1636_v44 = vrot.slane %v2676_v36, 4  ;;  %v2681_v46 = vadd.f32 %v1625_v42, %v1618_v37  ;;  %v1691_v42 = vcombine.high %v2047_v35, %v2047_v35 }
 0x322   :  { %v1642_v47 = vrot.slane %v2678_v39, 4  ;;  %v2684_v48 = vadd.f32 %v1629_v13, %v1619_v40 }
 0x323   :  { %v1637_v45 = vadd.f32 %v1636_v44, %v2676_v36  ;;  %v1730_v49 = vrot.slane %v2681_v46, 4 }
 0x324   :  { %v1643_v50 = vadd.f32 %v1642_v47, %v2678_v39  ;;  %v1736_v51 = vrot.slane %v2684_v48, 4 }
 0x325   :  { %v1731_v52 = vadd.f32 %v1730_v49, %v2681_v46  ;;  %v1638_v53 = vrot.slane %v1637_v45, 2 }
 0x326   :  { %v1737_v54 = vadd.f32 %v1736_v51, %v2684_v48  ;;  %v1644_v55 = vrot.slane %v1643_v50, 2 }
 0x327   :  { %v1732_v56 = vrot.slane %v1731_v52, 2  ;;  %v1639_v58 = vadd.f32 %v1638_v53, %v1637_v45 }
 0x328   :  { %v1738_v59 = vrot.slane %v1737_v54, 2  ;;  %v1645_v60 = vadd.f32 %v1644_v55, %v1643_v50 }
 0x329   :  { %v1640_v18 = vrot.slane %v1639_v58, 1  ;;  %v1733_v61 = vadd.f32 %v1732_v56, %v1731_v52 }
 0x32a   :  { %v1646_v62 = vrot.slane %v1645_v60, 1  ;;  %v1739_v63 = vadd.f32 %v1738_v59, %v1737_v54 }
 0x32b   :  { %v1641_v1 = vadd.f32 %v1640_v18, %v1639_v58  ;;  %v1734_v2 = vrot.slane %v1733_v61, 1 }
 0x32c   :  { %v1647_v3 = vadd.f32 %v1646_v62, %v1645_v60  ;;  %v1740_v4 = vrot.slane %v1739_v63, 1 }
 0x32d   :  { %v1735_v0 = vadd.f32 %v1734_v2, %v1733_v61 }
 0x32e   :  { %v1648_v19 = vadd.f32 %v1647_v3, %v1641_v1  ;;  %v1741_v5 = vadd.f32 %v1740_v4, %v1739_v63 }
 0x330   :  { %1649 = vrot.lane.b32.xlu0 %v1648_v19, %s2438_s5  ;;  %v1742_v6 = vadd.f32 %v1741_v5, %v1735_v0 }
 0x334   :  { %1743 = vrot.lane.b32.xlu0 %v1742_v6, %s2438_s5 }
 0x3a2   :  { %v1650_v7 = vpop.permute.xlu0 %1649 }
 0x3a3   :  { %v1653_v9 = vadd.f32 %v1650_v7, %v1648_v19 }
 0x3a5   :  { %1654 = vrot.lane.b32.xlu1 %v1653_v9, %s2439_s6 }
 0x3a6   :  { %v1744_v10 = vpop.permute.xlu0 %1743 }
 0x3a7   :  { %v1745_v11 = vadd.f32 %v1744_v10, %v1742_v6 }
 0x3a9   :  { %1746 = vrot.lane.b32.xlu1 %v1745_v11, %s2439_s6 }
 0x417   :  { %v1655_v15 = vpop.permute.xlu1 %1654 }
 0x418   :  { %v1656_v16 = vadd.f32 %v1655_v15, %v1653_v9 }
 0x41a   :  { %v1661_v20 = vrot.slane %v1656_v16, %v2596_v41 }
 0x41b   :  { %v1747_v21 = vpop.permute.xlu1 %1746 }
 0x41c   :  { %v1748_v22 = vadd.f32 %v1747_v21, %v1745_v11  ;;  %v1673_v23 = vmul.f32 %v2046_v12, %v1661_v20  ;;  %v1674_v24 = vmul.f32 %v1670_v17, %v1661_v20 }
 0x41e   :  { %v1753_v25 = vrot.slane %v1748_v22, %v2596_v41  ;;  %v1676_v28 = vsel %vm1675_vm8, %v1673_v23, 0.0  ;;  %v1677_v29 = vsel %vm1675_vm8, %v1674_v24, 0.0 }
 0x41f   :  { %v1678_v30 = vadd.f32 %v1677_v29, %v1676_v28 }
 0x420   :  { %v1765_v8 = vmul.f32 %v2046_v12, %v1753_v25  ;;  %v1766_v31 = vmul.f32 %v1753_v25, %v1670_v17 }
 0x421   :  { %1679 = vadd.xlane.f32.xlu0 %v1678_v30  ;;  %v2382_v30 = vld [vmem:[%s2736_s0] sm:$0xff] }
 0x422   :  { %v1767_v32 = vsel %vm1675_vm8, %v1765_v8, 0.0  ;;  %v1768_v33 = vsel %vm1675_vm8, %v1766_v31, 0.0 }
 0x423   :  { %v1769_v34 = vadd.f32 %v1768_v33, %v1767_v32  ;;  %v2383_v32 = vld [vmem:[%s2736_s0 + $0x8] sm:$0xff] }
 0x425   :  { %1770 = vadd.xlane.f32.xlu1 %v1769_v34 }
 0x4ae   :  { %v1680_v41 = vpop.xlane.xlu0 %1679 }
 0x4af   :  { %v1681_v26 = vmax.f32 %v1680_v41, 0.0 }
 0x4b1   :  { %v1694_v13 = vmul.f32 %v2047_v35, %v1681_v26  ;;  %v1695_v14 = vmul.f32 %v1691_v42, %v1681_v26 }
 0x4b2   :  { %v1771_v57 = vpop.xlane.xlu1 %1770 }
 0x4b3   :  { %v1696_v27 = vsel %vm1675_vm8, %v1694_v13, 0.0  ;;  %v1703_v43 = vsel %vm1675_vm8, %v1695_v14, 0.0  ;;  %v1772_v37 = vmax.f32 %v1771_v57, 0.0 }
 0x4b4   :  { %v1697_v38 = vrot.slane %v1696_v27, 4  ;;  %v1704_v40 = vrot.slane %v1703_v43, 4 }
 0x4b5   :  { %v1785_v44 = vmul.f32 %v2047_v35, %v1772_v37  ;;  %v1786_v47 = vmul.f32 %v1772_v37, %v1691_v42 }
 0x4b6   :  { %v1698_v45 = vadd.f32 %v1697_v38, %v1696_v27  ;;  %v1705_v49 = vadd.f32 %v1704_v40, %v1703_v43 }
 0x4b7   :  { %v1787_v50 = vsel %vm1675_vm8, %v1785_v44, 0.0  ;;  %v1794_v51 = vsel %vm1675_vm8, %v1786_v47, 0.0 }
 0x4b8   :  { %v1699_v52 = vrot.slane %v1698_v45, 2  ;;  %v1706_v53 = vrot.slane %v1705_v49, 2  ;;  %v1788_v54 = vrot.slane %v1787_v50, 4  ;;  %v1795_v55 = vrot.slane %v1794_v51, 4 }
 0x4ba   :  { %v1700_v56 = vadd.f32 %v1699_v52, %v1698_v45  ;;  %v1707_v58 = vadd.f32 %v1706_v53, %v1705_v49  ;;  %v1789_v59 = vadd.f32 %v1788_v54, %v1787_v50  ;;  %v1796_v60 = vadd.f32 %v1795_v55, %v1794_v51 }
 0x4bc   :  { %v1701_v18 = vrot.slane %v1700_v56, 1  ;;  %v1708_v61 = vrot.slane %v1707_v58, 1  ;;  %v1790_v62 = vrot.slane %v1789_v59, 2  ;;  %v1797_v63 = vrot.slane %v1796_v60, 2 }
 0x4be   :  { %v1702_v1 = vadd.f32 %v1701_v18, %v1700_v56  ;;  %v1709_v2 = vadd.f32 %v1708_v61, %v1707_v58  ;;  %v1791_v3 = vadd.f32 %v1790_v62, %v1789_v59  ;;  %v1798_v4 = vadd.f32 %v1797_v63, %v1796_v60 }
 0x4c0   :  { %v2048_v19 = vmul.f32 -1.442695, %v1702_v1  ;;  %v2049_v0 = vmul.f32 -1.442695, %v1709_v2  ;;  %v1792_v5 = vrot.slane %v1791_v3, 1  ;;  %v1799_v6 = vrot.slane %v1798_v4, 1 }
 0x4c2   :  { %2366 = vpow2.f32 %v2048_v19  ;;  %v1793_v7 = vadd.f32 %v1792_v5, %v1791_v3  ;;  %v1800_v9 = vadd.f32 %v1799_v6, %v1798_v4 }
 0x4c3   :  { %2368 = vpow2.f32 %v2049_v0 }
 0x4c4   :  { %v2052_v10 = vmul.f32 -1.442695, %v1793_v7  ;;  %v2053_v11 = vmul.f32 -1.442695, %v1800_v9 }
 0x4c6   :  { %2370 = vpow2.f32 %v2052_v10 }
 0x4c7   :  { %2372 = vpow2.f32 %v2053_v11 }
 0x4cc   :  { %v2367_v12 = vpop.eup %2366 }
 0x4cd   :  { %v2369_v15 = vpop.eup %2368  ;;  %v1716_v16 = vadd.f32 1.0, %v2367_v12 }
 0x4ce   :  { %v1717_v17 = vadd.f32 1.0, %v2369_v15 }
 0x4cf   :  { %2374 = vrcp.f32 %v1716_v16 }
 0x4d0   :  { %v2371_v20 = vpop.eup %2370  ;;  %2376 = vrcp.f32 %v1717_v17 }
 0x4d1   :  { %v2373_v21 = vpop.eup %2372  ;;  %v1807_v22 = vadd.f32 1.0, %v2371_v20 }
 0x4d2   :  { %v1808_v23 = vadd.f32 1.0, %v2373_v21 }
 0x4d3   :  { %2378 = vrcp.f32 %v1807_v22 }
 0x4d4   :  { %2380 = vrcp.f32 %v1808_v23 }
 0x4d9   :  { %v2375_v24 = vpop.eup %2374 }
 0x4da   :  { %v2377_v25 = vpop.eup %2376  ;;  %v1722_v28 = vmul.f32 %v2375_v24, %v2676_v36 }
 0x4db   :  { %v1723_v29 = vmul.f32 %v2377_v25, %v2678_v39  ;;  %v2384_v39 = vld [vmem:[%s2736_s0 + $0x10] sm:$0xff] }
 0x4dc   :  { %v1724_v8 = vadd.f32 %v2382_v30, %v1722_v28 }
 0x4dd   :  { %v2379_v31 = vpop.eup %2378  ;;  %v1725_v33 = vadd.f32 %v2383_v32, %v1723_v29 }
 0x4de   :  { %v2381_v34 = vpop.eup %2380  ;;  %v1726_v35 = vmax.f32 %v1724_v8, 0.0  ;;  %v1813_v42 = vmul.f32 %v2379_v31, %v2681_v46  ;;  %v2385_v46 = vld [vmem:[%s2736_s0 + $0x18] sm:$0xff] }
 0x4df   :  { %v1727_v41 = vmax.f32 %v1725_v33, 0.0  ;;  %v1814_v36 = vmul.f32 %v2381_v34, %v2684_v48 }
 0x4e0   :  { %1728 = vst [vmem:[%s2745_s9] sm:$0xff] %v1726_v35  ;;  %v1815_v26 = vadd.f32 %v2384_v39, %v1813_v42 }
 0x4e1   :  { %1729 = vst [vmem:[%s2745_s9 + $0x8] sm:$0xff] %v1727_v41  ;;  %v1816_v13 = vadd.f32 %v2385_v46, %v1814_v36 }
 0x4e2   :  { %v1817_v14 = vmax.f32 %v1815_v26, 0.0 }
 0x4e3   :  { %v1818_v48 = vmax.f32 %v1816_v13, 0.0 }
 0x4e4   :  { %2054 = vst [vmem:[%s2745_s9 + $0x10] sm:$0xff] %v1817_v14 }
 0x4e5   :  { %2055 = vst [vmem:[%s2745_s9 + $0x18] sm:$0xff] %v1818_v48 }
 0x4e6   :  { %1826 = vsyncpa [#allocation3], 1 }
 0x4e7   :  { %1827 = vsyncpa [#allocation5], 1 }

</bundles_post_ra>
